<compile_context>
chip_gen: v7x
topology: tpu7x:2x2x1
jax: 0.10.0
libtpu: 0.0.40
codegen_flags: <defaults>
</compile_context>

<pallas_src>
import jax
import jax.numpy as jnp
import numpy as np
from jax import lax
from jax.experimental import pallas as pl
from jax.experimental.pallas import tpu as pltpu

EMB_DIM = 16      # embedding_dim
HIDDEN = 32       # hidden_dim
VOCAB = 50        # vocab_size
TAGSET = 8        # tagset_size


# ----------------------------------------------------------------------------
# Kernel
# ----------------------------------------------------------------------------
def _make_kernel(L, R, H, E, mxu_dtype):
    """Fused-direction, layer-skewed kernel for static sequence lengths L, R."""
    T = max(L, R)
    SHORT = min(L, R)
    G = 4 * H            # one gate block = 128 lanes = one f32 vreg
    TWO_E = 2 * E

    def kernel(x_ref, slab_ref, tag_ref, out_ref):
        # Slab layout (rows): [ Wx (2E) | W_skew (4H) | bias row (1) ]
        w_x = slab_ref[0:TWO_E, :]                          # (2E, 16H)
        w_skew = slab_ref[TWO_E:TWO_E + G, :]               # (4H, 16H)
        b_row = slab_ref[TWO_E + G:TWO_E + G + 1, :]        # (1, 16H)

        # Hoisted input projection for ALL timesteps (+1 dummy row), both
        # directions, with BOTH layers' biases folded in:
        #   (T+1, 2E) @ (2E, 16H) + (1, 16H) -> (T+1, 16H)
        # Layer-0 columns of row t hold x(t)@Wih0 + b0; layer-1 columns hold
        # b1 (constant) since Wx's layer-1 columns are zero.
        pre_all = (jnp.dot(x_ref[...], w_x, preferred_element_type=jnp.float32)
                   + b_row.astype(jnp.float32))

        def apply_gates(gates, c_prev):
            # gates: (1, 16H), layout [i | f | g | o], each block 4H wide with
            # inner order [l0_left, l0_right, l1_left, l1_right] — every slice
            # below is 128-lane (whole-vreg) aligned.
            i = jax.nn.sigmoid(gates[:, 0 * G:1 * G])
            f = jax.nn.sigmoid(gates[:, 1 * G:2 * G])
            g = jnp.tanh(gates[:, 2 * G:3 * G])
            o = jax.nn.sigmoid(gates[:, 3 * G:4 * G])
            c_new = f * c_prev + i * g
            h_new = o * jnp.tanh(c_new)
            return h_new, c_new

        # ---- Prologue (t = 0, layer 0 only): h == c == 0, so the recurrent
        # dot is skipped; gates0(0) == pre_all[0].  Its layer-1 columns are
        # just b1 -> the resulting layer-1 lanes are garbage and are zeroed.
        h, c = apply_gates(pre_all[0:1, :], jnp.zeros((1, G), jnp.float32))
        lane = lax.broadcasted_iota(jnp.int32, (1, G), 1)
        keep_l0 = (lane < 2 * H).astype(jnp.float32)
        h = h * keep_l0
        c = c * keep_l0

        snap = None
        # ---- Layer-skewed recurrence, fully unrolled (T static).  Iteration
        # k consumes the fused state [h0(k), h1(k-1)] and produces
        # [h0(k+1), h1(k)] with ONE (1,4H)@(4H,16H) MXU op.
        for k in range(T):
            gates = (jnp.dot(h.astype(mxu_dtype), w_skew,
                             preferred_element_type=jnp.float32)
                     + pre_all[k + 1:k + 2, :])
            h, c = apply_gates(gates, c)
            if L != R and k == SHORT - 1:
                # h1 of the shorter direction is final here.  The fused
                # weights are strictly block-diagonal per direction, so later
                # (garbage) updates of those lanes can never contaminate the
                # live direction -> no per-step freeze needed.
                snap = h[:, 3 * H:4 * H] if R < L else h[:, 2 * H:3 * H]

        # Final [h1_left(L-1) | h1_right(R-1)]
        if L == R:
            h1 = h[:, 2 * H:4 * H]
        elif R < L:
            h1 = jnp.concatenate([h[:, 2 * H:3 * H], snap], axis=-1)
        else:
            h1 = jnp.concatenate([snap, h[:, 3 * H:4 * H]], axis=-1)

        # hidden2tag -> ReLU -> log_softmax(dim=1), as in the PyTorch module.
        w_tag = tag_ref[0:2 * H, :]
        b_tag = tag_ref[2 * H:2 * H + 1, :]
        tag = jnp.dot(h1, w_tag, preferred_element_type=jnp.float32) + b_tag
        tag = jnp.maximum(tag, 0.0)
        m = jnp.max(tag, axis=-1, keepdims=True)
        lse = m + jnp.log(jnp.sum(jnp.exp(tag - m), axis=-1, keepdims=True))
        out_ref[...] = tag - lse

    return kernel


# ----------------------------------------------------------------------------
# Wrapper-side weight packing (done once, outside the kernel)
# ----------------------------------------------------------------------------
def pack_params(p, mxu_dtype=jnp.float32):
    """Packs the 16 PyTorch-style parameter arrays into 2 fused slabs.

    INVARIANT (correctness of the no-freeze tail handling depends on it):
    every fused weight is strictly block-diagonal per direction — left-input
    rows only ever feed left-output columns and right-input rows only feed
    right-output columns.  A garbage value in a dead direction's lanes can
    therefore never reach the live direction's gate columns.

    Gate column layout (width 16H): [i | f | g | o], each block 4H wide with
    inner part order [layer0_left, layer0_right, layer1_left, layer1_right].
    Fused state row layout (width 4H): [h0_left | h0_right | h1_left | h1_right].
    """
    H, E = HIDDEN, EMB_DIM
    G = 4 * H
    W16 = 16 * H

    def col(gi, pi):
        return slice(gi * G + pi * H, gi * G + (pi + 1) * H)

    def f32(a):
        return np.asarray(a, np.float32)

    # Input projection Wx: rows [x_left(E) | x_right(E)]; layer-1 cols zero.
    Wx = np.zeros((2 * E, W16), np.float32)
    for gi in range(4):
        Wx[0:E, col(gi, 0)] = f32(p['l_wih0'])[:, gi * H:(gi + 1) * H]
        Wx[E:2 * E, col(gi, 1)] = f32(p['r_wih0'])[:, gi * H:(gi + 1) * H]

    # Skewed recurrent weight: rows [h0_l | h0_r | h1_l | h1_r].
    Wskew = np.zeros((G, W16), np.float32)
    for gi in range(4):
        Wskew[0 * H:1 * H, col(gi, 0)] = f32(p['l_whh0'])[:, gi * H:(gi + 1) * H]
        Wskew[1 * H:2 * H, col(gi, 1)] = f32(p['r_whh0'])[:, gi * H:(gi + 1) * H]
        Wskew[0 * H:1 * H, col(gi, 2)] = f32(p['l_wih1'])[:, gi * H:(gi + 1) * H]
        Wskew[1 * H:2 * H, col(gi, 3)] = f32(p['r_wih1'])[:, gi * H:(gi + 1) * H]
        Wskew[2 * H:3 * H, col(gi, 2)] = f32(p['l_whh1'])[:, gi * H:(gi + 1) * H]
        Wskew[3 * H:4 * H, col(gi, 3)] = f32(p['r_whh1'])[:, gi * H:(gi + 1) * H]

    # Fused bias row: layer-0 and layer-1 biases, both directions.
    b_full = np.zeros((1, W16), np.float32)
    for gi in range(4):
        b_full[:, col(gi, 0)] = f32(p['l_b0'])[:, gi * H:(gi + 1) * H]
        b_full[:, col(gi, 1)] = f32(p['r_b0'])[:, gi * H:(gi + 1) * H]
        b_full[:, col(gi, 2)] = f32(p['l_b1'])[:, gi * H:(gi + 1) * H]
        b_full[:, col(gi, 3)] = f32(p['r_b1'])[:, gi * H:(gi + 1) * H]

    slab = np.concatenate([Wx, Wskew, b_full], axis=0)            # (2E+4H+1, 16H)
    tag_slab = np.concatenate([f32(p['w_tag']), f32(p['b_tag'])], axis=0)  # (2H+1, TAG)

    return {
        'slab': jnp.asarray(slab, mxu_dtype),   # MXU operands (f32 or bf16)
        'tag': jnp.asarray(tag_slab, jnp.float32),
    }


def lstm_lm_forward(left_embeds, right_embeds, packed):
    L, E = left_embeds.shape
    R, _ = right_embeds.shape
    T = max(L, R)
    dt = packed['slab'].dtype

    # Pad the shorter direction with zero rows (+1 dummy row used only by the
    # last skewed iteration's never-read layer-0 output).  Block-diagonal
    # fused weights guarantee the padding never affects the live direction.
    x = jnp.zeros((T + 1, 2 * E), jnp.float32)
    x = x.at[:L, :E].set(left_embeds)
    x = x.at[:R, E:].set(right_embeds)
    x = x.astype(dt)

    kernel = _make_kernel(L, R, HIDDEN, E, dt)
    ins = (x, packed['slab'], packed['tag'])
    return pl.pallas_call(
        kernel,
        out_shape=jax.ShapeDtypeStruct((1, TAGSET), jnp.float32),
        in_specs=[pl.BlockSpec(memory_space=pltpu.MemorySpace.VMEM)] * len(ins),
        out_specs=pl.BlockSpec(memory_space=pltpu.MemorySpace.VMEM),
    )(*ins)


# ----------------------------------------------------------------------------
# Parameter init + pure-JAX reference (verification only)
# ----------------------------------------------------------------------------
def init_params(key):
    ks = jax.random.split(key, 20)
    s = 1.0 / np.sqrt(HIDDEN)

    def u(k, shape, scale=s):
        return jax.random.uniform(k, shape, jnp.float32, -scale, scale)

    params = {'embedding': jax.random.normal(ks[0], (VOCAB, EMB_DIM), jnp.float32)}
    idx = 1
    for side in ('l', 'r'):
        params[f'{side}_wih0'] = u(ks[idx], (EMB_DIM, 4 * HIDDEN)); idx += 1
        params[f'{side}_whh0'] = u(ks[idx], (HIDDEN, 4 * HIDDEN)); idx += 1
        # PyTorch has separate bias_ih + bias_hh; they always enter as a sum.
        params[f'{side}_b0'] = u(ks[idx], (1, 4 * HIDDEN)) + u(ks[idx + 1], (1, 4 * HIDDEN)); idx += 2
        params[f'{side}_wih1'] = u(ks[idx], (HIDDEN, 4 * HIDDEN)); idx += 1
        params[f'{side}_whh1'] = u(ks[idx], (HIDDEN, 4 * HIDDEN)); idx += 1
        params[f'{side}_b1'] = u(ks[idx], (1, 4 * HIDDEN)) + u(ks[idx + 1], (1, 4 * HIDDEN)); idx += 2
    st = 1.0 / np.sqrt(2 * HIDDEN)
    params['w_tag'] = u(ks[17], (2 * HIDDEN, TAGSET), st)
    params['b_tag'] = u(ks[18], (1, TAGSET), st)
    return params


def ref_forward(left_embeds, right_embeds, p):
    H = HIDDEN

    def cell(x_t, h, c, wih, whh, b):
        g = x_t @ wih + h @ whh + b
        i = jax.nn.sigmoid(g[:, :H]); f = jax.nn.sigmoid(g[:, H:2 * H])
        gg = jnp.tanh(g[:, 2 * H:3 * H]); o = jax.nn.sigmoid(g[:, 3 * H:])
        c = f * c + i * gg
        return o * jnp.tanh(c), c

    def run(x, wih0, whh0, b0, wih1, whh1, b1):
        h0 = c0 = h1 = c1 = jnp.zeros((1, H), jnp.float32)
        for t in range(x.shape[0]):
            h0, c0 = cell(x[t:t + 1], h0, c0, wih0, whh0, b0)
            h1, c1 = cell(h0, h1, c1, wih1, whh1, b1)
        return h1

    hl = run(left_embeds, p['l_wih0'], p['l_whh0'], p['l_b0'],
             p['l_wih1'], p['l_whh1'], p['l_b1'])
    hr = run(right_embeds, p['r_wih0'], p['r_whh0'], p['r_b0'],
             p['r_wih1'], p['r_whh1'], p['r_b1'])
    lr = jnp.concatenate([hl, hr], axis=-1)
    ts = jnp.maximum(lr @ p['w_tag'] + p['b_tag'], 0.0)
    return jax.nn.log_softmax(ts, axis=1)


if __name__ == "__main__":
    key = jax.random.PRNGKey(0)
    pkey, lk, rk = jax.random.split(key, 3)
    params = init_params(pkey)

    L_LEN, R_LEN = 8, 6
    left_ctx = jax.random.randint(lk, (L_LEN,), 0, VOCAB)
    right_ctx = jax.random.randint(rk, (R_LEN,), 0, VOCAB)

    # Embedding lookup (glue, outside the kernel).
    left_embeds = jnp.take(params['embedding'], left_ctx, axis=0)    # (L, E)
    right_embeds = jnp.take(params['embedding'], right_ctx, axis=0)  # (R, E)

    # --- f32 MXU operands: exact-class match vs the pure-JAX reference ---
    packed = pack_params(params, jnp.float32)

    # L > R
    out = jax.block_until_ready(lstm_lm_forward(left_embeds, right_embeds, packed))
    ref = ref_forward(left_embeds, right_embeds, params)
    assert out.shape == (1, TAGSET) and out.dtype == jnp.float32
    np.testing.assert_allclose(np.asarray(out), np.asarray(ref), rtol=1e-5, atol=1e-5)

    # L < R (exercises the other snapshot branch)
    out2 = jax.block_until_ready(lstm_lm_forward(right_embeds, left_embeds, packed))
    ref2 = ref_forward(right_embeds, left_embeds, params)
    np.testing.assert_allclose(np.asarray(out2), np.asarray(ref2), rtol=1e-5, atol=1e-5)

    # L == R (no snapshot branch)
    out3 = jax.block_until_ready(lstm_lm_forward(left_embeds, left_embeds, packed))
    ref3 = ref_forward(left_embeds, left_embeds, params)
    np.testing.assert_allclose(np.asarray(out3), np.asarray(ref3), rtol=1e-5, atol=1e-5)

    # --- bf16 MXU operands (f32 accumulation, f32 elementwise): the per-chip
    # perf recommendation; checked at a quantization-appropriate tolerance ---
    packed_bf16 = pack_params(params, jnp.bfloat16)
    out_bf16 = jax.block_until_ready(
        lstm_lm_forward(left_embeds, right_embeds, packed_bf16))
    np.testing.assert_allclose(np.asarray(out_bf16), np.asarray(ref),
                               rtol=0.0, atol=1e-1)

    print("KERNEL_OK")
</pallas_src>

<mosaic_0001>
module attributes {stable_mosaic.version = 11 : i64} {
  func.func @kernel(%arg0: memref<9x32xf32, #tpu.memory_space<vmem>>, %arg1: memref<161x512xf32, #tpu.memory_space<vmem>>, %arg2: memref<65x8xf32, #tpu.memory_space<vmem>>, %arg3: memref<1x8xf32, #tpu.memory_space<vmem>>) attributes {dimension_semantics = [], scalar_prefetch = 0 : i64, scratch_operands = 0 : i64, tpu.core_type = #tpu.core_type<tc>} {
    %c0 = arith.constant 0 : index
    %c0_0 = arith.constant 0 : index
    %0 = vector.load %arg1[%c0, %c0_0] : memref<161x512xf32, #tpu.memory_space<vmem>>, vector<32x512xf32>
    %c32 = arith.constant 32 : index
    %c0_1 = arith.constant 0 : index
    %1 = vector.load %arg1[%c32, %c0_1] : memref<161x512xf32, #tpu.memory_space<vmem>>, vector<128x512xf32>
    %c160 = arith.constant 160 : index
    %c0_2 = arith.constant 0 : index
    %2 = vector.load %arg1[%c160, %c0_2] : memref<161x512xf32, #tpu.memory_space<vmem>>, vector<1x512xf32>
    %c0_3 = arith.constant 0 : index
    %c0_4 = arith.constant 0 : index
    %3 = vector.load %arg0[%c0_3, %c0_4] : memref<9x32xf32, #tpu.memory_space<vmem>>, vector<9x32xf32>
    %cst = arith.constant dense<0.000000e+00> : vector<9x512xf32>
    %4 = tpu.matmul %3, %0, %cst {dimension_numbers = #tpu.dot_dimension_numbers<[1], [0], [0], [1], [0, 0, 1, 1], [], []>} : vector<9x32xf32>, vector<32x512xf32>, vector<9x512xf32> -> vector<9x512xf32>
    %5 = vector.broadcast %2 : vector<1x512xf32> to vector<9x512xf32>
    %6 = arith.addf %4, %5 : vector<9x512xf32>
    %7 = vector.extract_strided_slice %6 {offsets = [0, 0], sizes = [1, 512], strides = [1, 1]} : vector<9x512xf32> to vector<1x512xf32>
    %cst_5 = arith.constant 0.000000e+00 : f32
    %8 = vector.broadcast %cst_5 : f32 to vector<1x128xf32>
    %9 = vector.extract_strided_slice %7 {offsets = [0, 0], sizes = [1, 128], strides = [1, 1]} : vector<1x512xf32> to vector<1x128xf32>
    %10 = arith.negf %9 : vector<1x128xf32>
    %11 = math.exp %10 : vector<1x128xf32>
    %cst_6 = arith.constant 1.000000e+00 : f32
    %12 = vector.broadcast %cst_6 : f32 to vector<1x128xf32>
    %13 = arith.addf %12, %11 : vector<1x128xf32>
    %14 = arith.divf %12, %13 : vector<1x128xf32>
    %15 = vector.extract_strided_slice %7 {offsets = [0, 128], sizes = [1, 128], strides = [1, 1]} : vector<1x512xf32> to vector<1x128xf32>
    %16 = arith.negf %15 : vector<1x128xf32>
    %17 = math.exp %16 : vector<1x128xf32>
    %cst_7 = arith.constant 1.000000e+00 : f32
    %18 = vector.broadcast %cst_7 : f32 to vector<1x128xf32>
    %19 = arith.addf %18, %17 : vector<1x128xf32>
    %20 = arith.divf %18, %19 : vector<1x128xf32>
    %21 = vector.extract_strided_slice %7 {offsets = [0, 256], sizes = [1, 128], strides = [1, 1]} : vector<1x512xf32> to vector<1x128xf32>
    %22 = math.tanh %21 : vector<1x128xf32>
    %23 = vector.extract_strided_slice %7 {offsets = [0, 384], sizes = [1, 128], strides = [1, 1]} : vector<1x512xf32> to vector<1x128xf32>
    %24 = arith.negf %23 : vector<1x128xf32>
    %25 = math.exp %24 : vector<1x128xf32>
    %cst_8 = arith.constant 1.000000e+00 : f32
    %26 = vector.broadcast %cst_8 : f32 to vector<1x128xf32>
    %27 = arith.addf %26, %25 : vector<1x128xf32>
    %28 = arith.divf %26, %27 : vector<1x128xf32>
    %29 = arith.mulf %20, %8 : vector<1x128xf32>
    %30 = arith.mulf %14, %22 : vector<1x128xf32>
    %31 = arith.addf %29, %30 : vector<1x128xf32>
    %32 = math.tanh %31 : vector<1x128xf32>
    %33 = arith.mulf %28, %32 : vector<1x128xf32>
    %34 = tpu.iota {dimensions = array<i32: 1>} : vector<1x128xi32>
    %c64_i32 = arith.constant 64 : i32
    %35 = vector.broadcast %c64_i32 : i32 to vector<1x128xi32>
    %36 = arith.cmpi slt, %34, %35 : vector<1x128xi32>
    %37 = arith.extui %36 : vector<1x128xi1> to vector<1x128xi32>
    %38 = arith.sitofp %37 : vector<1x128xi32> to vector<1x128xf32>
    %39 = arith.mulf %33, %38 : vector<1x128xf32>
    %40 = arith.mulf %31, %38 : vector<1x128xf32>
    %cst_9 = arith.constant dense<0.000000e+00> : vector<1x512xf32>
    %41 = tpu.matmul %39, %1, %cst_9 {dimension_numbers = #tpu.dot_dimension_numbers<[1], [0], [0], [1], [0, 0, 1, 1], [], []>} : vector<1x128xf32>, vector<128x512xf32>, vector<1x512xf32> -> vector<1x512xf32>
    %42 = vector.extract_strided_slice %6 {offsets = [1, 0], sizes = [1, 512], strides = [1, 1]} : vector<9x512xf32> to vector<1x512xf32>
    %43 = arith.addf %41, %42 : vector<1x512xf32>
    %44 = vector.extract_strided_slice %43 {offsets = [0, 0], sizes = [1, 128], strides = [1, 1]} : vector<1x512xf32> to vector<1x128xf32>
    %45 = arith.negf %44 : vector<1x128xf32>
    %46 = math.exp %45 : vector<1x128xf32>
    %cst_10 = arith.constant 1.000000e+00 : f32
    %47 = vector.broadcast %cst_10 : f32 to vector<1x128xf32>
    %48 = arith.addf %47, %46 : vector<1x128xf32>
    %49 = arith.divf %47, %48 : vector<1x128xf32>
    %50 = vector.extract_strided_slice %43 {offsets = [0, 128], sizes = [1, 128], strides = [1, 1]} : vector<1x512xf32> to vector<1x128xf32>
    %51 = arith.negf %50 : vector<1x128xf32>
    %52 = math.exp %51 : vector<1x128xf32>
    %cst_11 = arith.constant 1.000000e+00 : f32
    %53 = vector.broadcast %cst_11 : f32 to vector<1x128xf32>
    %54 = arith.addf %53, %52 : vector<1x128xf32>
    %55 = arith.divf %53, %54 : vector<1x128xf32>
    %56 = vector.extract_strided_slice %43 {offsets = [0, 256], sizes = [1, 128], strides = [1, 1]} : vector<1x512xf32> to vector<1x128xf32>
    %57 = math.tanh %56 : vector<1x128xf32>
    %58 = vector.extract_strided_slice %43 {offsets = [0, 384], sizes = [1, 128], strides = [1, 1]} : vector<1x512xf32> to vector<1x128xf32>
    %59 = arith.negf %58 : vector<1x128xf32>
    %60 = math.exp %59 : vector<1x128xf32>
    %cst_12 = arith.constant 1.000000e+00 : f32
    %61 = vector.broadcast %cst_12 : f32 to vector<1x128xf32>
    %62 = arith.addf %61, %60 : vector<1x128xf32>
    %63 = arith.divf %61, %62 : vector<1x128xf32>
    %64 = arith.mulf %55, %40 : vector<1x128xf32>
    %65 = arith.mulf %49, %57 : vector<1x128xf32>
    %66 = arith.addf %64, %65 : vector<1x128xf32>
    %67 = math.tanh %66 : vector<1x128xf32>
    %68 = arith.mulf %63, %67 : vector<1x128xf32>
    %cst_13 = arith.constant dense<0.000000e+00> : vector<1x512xf32>
    %69 = tpu.matmul %68, %1, %cst_13 {dimension_numbers = #tpu.dot_dimension_numbers<[1], [0], [0], [1], [0, 0, 1, 1], [], []>} : vector<1x128xf32>, vector<128x512xf32>, vector<1x512xf32> -> vector<1x512xf32>
    %70 = vector.extract_strided_slice %6 {offsets = [2, 0], sizes = [1, 512], strides = [1, 1]} : vector<9x512xf32> to vector<1x512xf32>
    %71 = arith.addf %69, %70 : vector<1x512xf32>
    %72 = vector.extract_strided_slice %71 {offsets = [0, 0], sizes = [1, 128], strides = [1, 1]} : vector<1x512xf32> to vector<1x128xf32>
    %73 = arith.negf %72 : vector<1x128xf32>
    %74 = math.exp %73 : vector<1x128xf32>
    %cst_14 = arith.constant 1.000000e+00 : f32
    %75 = vector.broadcast %cst_14 : f32 to vector<1x128xf32>
    %76 = arith.addf %75, %74 : vector<1x128xf32>
    %77 = arith.divf %75, %76 : vector<1x128xf32>
    %78 = vector.extract_strided_slice %71 {offsets = [0, 128], sizes = [1, 128], strides = [1, 1]} : vector<1x512xf32> to vector<1x128xf32>
    %79 = arith.negf %78 : vector<1x128xf32>
    %80 = math.exp %79 : vector<1x128xf32>
    %cst_15 = arith.constant 1.000000e+00 : f32
    %81 = vector.broadcast %cst_15 : f32 to vector<1x128xf32>
    %82 = arith.addf %81, %80 : vector<1x128xf32>
    %83 = arith.divf %81, %82 : vector<1x128xf32>
    %84 = vector.extract_strided_slice %71 {offsets = [0, 256], sizes = [1, 128], strides = [1, 1]} : vector<1x512xf32> to vector<1x128xf32>
    %85 = math.tanh %84 : vector<1x128xf32>
    %86 = vector.extract_strided_slice %71 {offsets = [0, 384], sizes = [1, 128], strides = [1, 1]} : vector<1x512xf32> to vector<1x128xf32>
    %87 = arith.negf %86 : vector<1x128xf32>
    %88 = math.exp %87 : vector<1x128xf32>
    %cst_16 = arith.constant 1.000000e+00 : f32
    %89 = vector.broadcast %cst_16 : f32 to vector<1x128xf32>
    %90 = arith.addf %89, %88 : vector<1x128xf32>
    %91 = arith.divf %89, %90 : vector<1x128xf32>
    %92 = arith.mulf %83, %66 : vector<1x128xf32>
    %93 = arith.mulf %77, %85 : vector<1x128xf32>
    %94 = arith.addf %92, %93 : vector<1x128xf32>
    %95 = math.tanh %94 : vector<1x128xf32>
    %96 = arith.mulf %91, %95 : vector<1x128xf32>
    %cst_17 = arith.constant dense<0.000000e+00> : vector<1x512xf32>
    %97 = tpu.matmul %96, %1, %cst_17 {dimension_numbers = #tpu.dot_dimension_numbers<[1], [0], [0], [1], [0, 0, 1, 1], [], []>} : vector<1x128xf32>, vector<128x512xf32>, vector<1x512xf32> -> vector<1x512xf32>
    %98 = vector.extract_strided_slice %6 {offsets = [3, 0], sizes = [1, 512], strides = [1, 1]} : vector<9x512xf32> to vector<1x512xf32>
    %99 = arith.addf %97, %98 : vector<1x512xf32>
    %100 = vector.extract_strided_slice %99 {offsets = [0, 0], sizes = [1, 128], strides = [1, 1]} : vector<1x512xf32> to vector<1x128xf32>
    %101 = arith.negf %100 : vector<1x128xf32>
    %102 = math.exp %101 : vector<1x128xf32>
    %cst_18 = arith.constant 1.000000e+00 : f32
    %103 = vector.broadcast %cst_18 : f32 to vector<1x128xf32>
    %104 = arith.addf %103, %102 : vector<1x128xf32>
    %105 = arith.divf %103, %104 : vector<1x128xf32>
    %106 = vector.extract_strided_slice %99 {offsets = [0, 128], sizes = [1, 128], strides = [1, 1]} : vector<1x512xf32> to vector<1x128xf32>
    %107 = arith.negf %106 : vector<1x128xf32>
    %108 = math.exp %107 : vector<1x128xf32>
    %cst_19 = arith.constant 1.000000e+00 : f32
    %109 = vector.broadcast %cst_19 : f32 to vector<1x128xf32>
    %110 = arith.addf %109, %108 : vector<1x128xf32>
    %111 = arith.divf %109, %110 : vector<1x128xf32>
    %112 = vector.extract_strided_slice %99 {offsets = [0, 256], sizes = [1, 128], strides = [1, 1]} : vector<1x512xf32> to vector<1x128xf32>
    %113 = math.tanh %112 : vector<1x128xf32>
    %114 = vector.extract_strided_slice %99 {offsets = [0, 384], sizes = [1, 128], strides = [1, 1]} : vector<1x512xf32> to vector<1x128xf32>
    %115 = arith.negf %114 : vector<1x128xf32>
    %116 = math.exp %115 : vector<1x128xf32>
    %cst_20 = arith.constant 1.000000e+00 : f32
    %117 = vector.broadcast %cst_20 : f32 to vector<1x128xf32>
    %118 = arith.addf %117, %116 : vector<1x128xf32>
    %119 = arith.divf %117, %118 : vector<1x128xf32>
    %120 = arith.mulf %111, %94 : vector<1x128xf32>
    %121 = arith.mulf %105, %113 : vector<1x128xf32>
    %122 = arith.addf %120, %121 : vector<1x128xf32>
    %123 = math.tanh %122 : vector<1x128xf32>
    %124 = arith.mulf %119, %123 : vector<1x128xf32>
    %cst_21 = arith.constant dense<0.000000e+00> : vector<1x512xf32>
    %125 = tpu.matmul %124, %1, %cst_21 {dimension_numbers = #tpu.dot_dimension_numbers<[1], [0], [0], [1], [0, 0, 1, 1], [], []>} : vector<1x128xf32>, vector<128x512xf32>, vector<1x512xf32> -> vector<1x512xf32>
    %126 = vector.extract_strided_slice %6 {offsets = [4, 0], sizes = [1, 512], strides = [1, 1]} : vector<9x512xf32> to vector<1x512xf32>
    %127 = arith.addf %125, %126 : vector<1x512xf32>
    %128 = vector.extract_strided_slice %127 {offsets = [0, 0], sizes = [1, 128], strides = [1, 1]} : vector<1x512xf32> to vector<1x128xf32>
    %129 = arith.negf %128 : vector<1x128xf32>
    %130 = math.exp %129 : vector<1x128xf32>
    %cst_22 = arith.constant 1.000000e+00 : f32
    %131 = vector.broadcast %cst_22 : f32 to vector<1x128xf32>
    %132 = arith.addf %131, %130 : vector<1x128xf32>
    %133 = arith.divf %131, %132 : vector<1x128xf32>
    %134 = vector.extract_strided_slice %127 {offsets = [0, 128], sizes = [1, 128], strides = [1, 1]} : vector<1x512xf32> to vector<1x128xf32>
    %135 = arith.negf %134 : vector<1x128xf32>
    %136 = math.exp %135 : vector<1x128xf32>
    %cst_23 = arith.constant 1.000000e+00 : f32
    %137 = vector.broadcast %cst_23 : f32 to vector<1x128xf32>
    %138 = arith.addf %137, %136 : vector<1x128xf32>
    %139 = arith.divf %137, %138 : vector<1x128xf32>
    %140 = vector.extract_strided_slice %127 {offsets = [0, 256], sizes = [1, 128], strides = [1, 1]} : vector<1x512xf32> to vector<1x128xf32>
    %141 = math.tanh %140 : vector<1x128xf32>
    %142 = vector.extract_strided_slice %127 {offsets = [0, 384], sizes = [1, 128], strides = [1, 1]} : vector<1x512xf32> to vector<1x128xf32>
    %143 = arith.negf %142 : vector<1x128xf32>
    %144 = math.exp %143 : vector<1x128xf32>
    %cst_24 = arith.constant 1.000000e+00 : f32
    %145 = vector.broadcast %cst_24 : f32 to vector<1x128xf32>
    %146 = arith.addf %145, %144 : vector<1x128xf32>
    %147 = arith.divf %145, %146 : vector<1x128xf32>
    %148 = arith.mulf %139, %122 : vector<1x128xf32>
    %149 = arith.mulf %133, %141 : vector<1x128xf32>
    %150 = arith.addf %148, %149 : vector<1x128xf32>
    %151 = math.tanh %150 : vector<1x128xf32>
    %152 = arith.mulf %147, %151 : vector<1x128xf32>
    %cst_25 = arith.constant dense<0.000000e+00> : vector<1x512xf32>
    %153 = tpu.matmul %152, %1, %cst_25 {dimension_numbers = #tpu.dot_dimension_numbers<[1], [0], [0], [1], [0, 0, 1, 1], [], []>} : vector<1x128xf32>, vector<128x512xf32>, vector<1x512xf32> -> vector<1x512xf32>
    %154 = vector.extract_strided_slice %6 {offsets = [5, 0], sizes = [1, 512], strides = [1, 1]} : vector<9x512xf32> to vector<1x512xf32>
    %155 = arith.addf %153, %154 : vector<1x512xf32>
    %156 = vector.extract_strided_slice %155 {offsets = [0, 0], sizes = [1, 128], strides = [1, 1]} : vector<1x512xf32> to vector<1x128xf32>
    %157 = arith.negf %156 : vector<1x128xf32>
    %158 = math.exp %157 : vector<1x128xf32>
    %cst_26 = arith.constant 1.000000e+00 : f32
    %159 = vector.broadcast %cst_26 : f32 to vector<1x128xf32>
    %160 = arith.addf %159, %158 : vector<1x128xf32>
    %161 = arith.divf %159, %160 : vector<1x128xf32>
    %162 = vector.extract_strided_slice %155 {offsets = [0, 128], sizes = [1, 128], strides = [1, 1]} : vector<1x512xf32> to vector<1x128xf32>
    %163 = arith.negf %162 : vector<1x128xf32>
    %164 = math.exp %163 : vector<1x128xf32>
    %cst_27 = arith.constant 1.000000e+00 : f32
    %165 = vector.broadcast %cst_27 : f32 to vector<1x128xf32>
    %166 = arith.addf %165, %164 : vector<1x128xf32>
    %167 = arith.divf %165, %166 : vector<1x128xf32>
    %168 = vector.extract_strided_slice %155 {offsets = [0, 256], sizes = [1, 128], strides = [1, 1]} : vector<1x512xf32> to vector<1x128xf32>
    %169 = math.tanh %168 : vector<1x128xf32>
    %170 = vector.extract_strided_slice %155 {offsets = [0, 384], sizes = [1, 128], strides = [1, 1]} : vector<1x512xf32> to vector<1x128xf32>
    %171 = arith.negf %170 : vector<1x128xf32>
    %172 = math.exp %171 : vector<1x128xf32>
    %cst_28 = arith.constant 1.000000e+00 : f32
    %173 = vector.broadcast %cst_28 : f32 to vector<1x128xf32>
    %174 = arith.addf %173, %172 : vector<1x128xf32>
    %175 = arith.divf %173, %174 : vector<1x128xf32>
    %176 = arith.mulf %167, %150 : vector<1x128xf32>
    %177 = arith.mulf %161, %169 : vector<1x128xf32>
    %178 = arith.addf %176, %177 : vector<1x128xf32>
    %179 = math.tanh %178 : vector<1x128xf32>
    %180 = arith.mulf %175, %179 : vector<1x128xf32>
    %cst_29 = arith.constant dense<0.000000e+00> : vector<1x512xf32>
    %181 = tpu.matmul %180, %1, %cst_29 {dimension_numbers = #tpu.dot_dimension_numbers<[1], [0], [0], [1], [0, 0, 1, 1], [], []>} : vector<1x128xf32>, vector<128x512xf32>, vector<1x512xf32> -> vector<1x512xf32>
    %182 = vector.extract_strided_slice %6 {offsets = [6, 0], sizes = [1, 512], strides = [1, 1]} : vector<9x512xf32> to vector<1x512xf32>
    %183 = arith.addf %181, %182 : vector<1x512xf32>
    %184 = vector.extract_strided_slice %183 {offsets = [0, 0], sizes = [1, 128], strides = [1, 1]} : vector<1x512xf32> to vector<1x128xf32>
    %185 = arith.negf %184 : vector<1x128xf32>
    %186 = math.exp %185 : vector<1x128xf32>
    %cst_30 = arith.constant 1.000000e+00 : f32
    %187 = vector.broadcast %cst_30 : f32 to vector<1x128xf32>
    %188 = arith.addf %187, %186 : vector<1x128xf32>
    %189 = arith.divf %187, %188 : vector<1x128xf32>
    %190 = vector.extract_strided_slice %183 {offsets = [0, 128], sizes = [1, 128], strides = [1, 1]} : vector<1x512xf32> to vector<1x128xf32>
    %191 = arith.negf %190 : vector<1x128xf32>
    %192 = math.exp %191 : vector<1x128xf32>
    %cst_31 = arith.constant 1.000000e+00 : f32
    %193 = vector.broadcast %cst_31 : f32 to vector<1x128xf32>
    %194 = arith.addf %193, %192 : vector<1x128xf32>
    %195 = arith.divf %193, %194 : vector<1x128xf32>
    %196 = vector.extract_strided_slice %183 {offsets = [0, 256], sizes = [1, 128], strides = [1, 1]} : vector<1x512xf32> to vector<1x128xf32>
    %197 = math.tanh %196 : vector<1x128xf32>
    %198 = vector.extract_strided_slice %183 {offsets = [0, 384], sizes = [1, 128], strides = [1, 1]} : vector<1x512xf32> to vector<1x128xf32>
    %199 = arith.negf %198 : vector<1x128xf32>
    %200 = math.exp %199 : vector<1x128xf32>
    %cst_32 = arith.constant 1.000000e+00 : f32
    %201 = vector.broadcast %cst_32 : f32 to vector<1x128xf32>
    %202 = arith.addf %201, %200 : vector<1x128xf32>
    %203 = arith.divf %201, %202 : vector<1x128xf32>
    %204 = arith.mulf %195, %178 : vector<1x128xf32>
    %205 = arith.mulf %189, %197 : vector<1x128xf32>
    %206 = arith.addf %204, %205 : vector<1x128xf32>
    %207 = math.tanh %206 : vector<1x128xf32>
    %208 = arith.mulf %203, %207 : vector<1x128xf32>
    %209 = vector.extract_strided_slice %208 {offsets = [0, 96], sizes = [1, 32], strides = [1, 1]} : vector<1x128xf32> to vector<1x32xf32>
    %cst_33 = arith.constant dense<0.000000e+00> : vector<1x512xf32>
    %210 = tpu.matmul %208, %1, %cst_33 {dimension_numbers = #tpu.dot_dimension_numbers<[1], [0], [0], [1], [0, 0, 1, 1], [], []>} : vector<1x128xf32>, vector<128x512xf32>, vector<1x512xf32> -> vector<1x512xf32>
    %211 = vector.extract_strided_slice %6 {offsets = [7, 0], sizes = [1, 512], strides = [1, 1]} : vector<9x512xf32> to vector<1x512xf32>
    %212 = arith.addf %210, %211 : vector<1x512xf32>
    %213 = vector.extract_strided_slice %212 {offsets = [0, 0], sizes = [1, 128], strides = [1, 1]} : vector<1x512xf32> to vector<1x128xf32>
    %214 = arith.negf %213 : vector<1x128xf32>
    %215 = math.exp %214 : vector<1x128xf32>
    %cst_34 = arith.constant 1.000000e+00 : f32
    %216 = vector.broadcast %cst_34 : f32 to vector<1x128xf32>
    %217 = arith.addf %216, %215 : vector<1x128xf32>
    %218 = arith.divf %216, %217 : vector<1x128xf32>
    %219 = vector.extract_strided_slice %212 {offsets = [0, 128], sizes = [1, 128], strides = [1, 1]} : vector<1x512xf32> to vector<1x128xf32>
    %220 = arith.negf %219 : vector<1x128xf32>
    %221 = math.exp %220 : vector<1x128xf32>
    %cst_35 = arith.constant 1.000000e+00 : f32
    %222 = vector.broadcast %cst_35 : f32 to vector<1x128xf32>
    %223 = arith.addf %222, %221 : vector<1x128xf32>
    %224 = arith.divf %222, %223 : vector<1x128xf32>
    %225 = vector.extract_strided_slice %212 {offsets = [0, 256], sizes = [1, 128], strides = [1, 1]} : vector<1x512xf32> to vector<1x128xf32>
    %226 = math.tanh %225 : vector<1x128xf32>
    %227 = vector.extract_strided_slice %212 {offsets = [0, 384], sizes = [1, 128], strides = [1, 1]} : vector<1x512xf32> to vector<1x128xf32>
    %228 = arith.negf %227 : vector<1x128xf32>
    %229 = math.exp %228 : vector<1x128xf32>
    %cst_36 = arith.constant 1.000000e+00 : f32
    %230 = vector.broadcast %cst_36 : f32 to vector<1x128xf32>
    %231 = arith.addf %230, %229 : vector<1x128xf32>
    %232 = arith.divf %230, %231 : vector<1x128xf32>
    %233 = arith.mulf %224, %206 : vector<1x128xf32>
    %234 = arith.mulf %218, %226 : vector<1x128xf32>
    %235 = arith.addf %233, %234 : vector<1x128xf32>
    %236 = math.tanh %235 : vector<1x128xf32>
    %237 = arith.mulf %232, %236 : vector<1x128xf32>
    %cst_37 = arith.constant dense<0.000000e+00> : vector<1x512xf32>
    %238 = tpu.matmul %237, %1, %cst_37 {dimension_numbers = #tpu.dot_dimension_numbers<[1], [0], [0], [1], [0, 0, 1, 1], [], []>} : vector<1x128xf32>, vector<128x512xf32>, vector<1x512xf32> -> vector<1x512xf32>
    %239 = vector.extract_strided_slice %6 {offsets = [8, 0], sizes = [1, 512], strides = [1, 1]} : vector<9x512xf32> to vector<1x512xf32>
    %240 = arith.addf %238, %239 : vector<1x512xf32>
    %241 = vector.extract_strided_slice %240 {offsets = [0, 0], sizes = [1, 128], strides = [1, 1]} : vector<1x512xf32> to vector<1x128xf32>
    %242 = arith.negf %241 : vector<1x128xf32>
    %243 = math.exp %242 : vector<1x128xf32>
    %cst_38 = arith.constant 1.000000e+00 : f32
    %244 = vector.broadcast %cst_38 : f32 to vector<1x128xf32>
    %245 = arith.addf %244, %243 : vector<1x128xf32>
    %246 = arith.divf %244, %245 : vector<1x128xf32>
    %247 = vector.extract_strided_slice %240 {offsets = [0, 128], sizes = [1, 128], strides = [1, 1]} : vector<1x512xf32> to vector<1x128xf32>
    %248 = arith.negf %247 : vector<1x128xf32>
    %249 = math.exp %248 : vector<1x128xf32>
    %cst_39 = arith.constant 1.000000e+00 : f32
    %250 = vector.broadcast %cst_39 : f32 to vector<1x128xf32>
    %251 = arith.addf %250, %249 : vector<1x128xf32>
    %252 = arith.divf %250, %251 : vector<1x128xf32>
    %253 = vector.extract_strided_slice %240 {offsets = [0, 256], sizes = [1, 128], strides = [1, 1]} : vector<1x512xf32> to vector<1x128xf32>
    %254 = math.tanh %253 : vector<1x128xf32>
    %255 = vector.extract_strided_slice %240 {offsets = [0, 384], sizes = [1, 128], strides = [1, 1]} : vector<1x512xf32> to vector<1x128xf32>
    %256 = arith.negf %255 : vector<1x128xf32>
    %257 = math.exp %256 : vector<1x128xf32>
    %cst_40 = arith.constant 1.000000e+00 : f32
    %258 = vector.broadcast %cst_40 : f32 to vector<1x128xf32>
    %259 = arith.addf %258, %257 : vector<1x128xf32>
    %260 = arith.divf %258, %259 : vector<1x128xf32>
    %261 = arith.mulf %252, %235 : vector<1x128xf32>
    %262 = arith.mulf %246, %254 : vector<1x128xf32>
    %263 = arith.addf %261, %262 : vector<1x128xf32>
    %264 = math.tanh %263 : vector<1x128xf32>
    %265 = arith.mulf %260, %264 : vector<1x128xf32>
    %266 = vector.extract_strided_slice %265 {offsets = [0, 64], sizes = [1, 32], strides = [1, 1]} : vector<1x128xf32> to vector<1x32xf32>
    %267 = tpu.concatenate %266, %209 in 1 : vector<1x32xf32>, vector<1x32xf32> -> vector<1x64xf32>
    %c0_41 = arith.constant 0 : index
    %c0_42 = arith.constant 0 : index
    %268 = vector.load %arg2[%c0_41, %c0_42] : memref<65x8xf32, #tpu.memory_space<vmem>>, vector<64x8xf32>
    %c64 = arith.constant 64 : index
    %c0_43 = arith.constant 0 : index
    %269 = vector.load %arg2[%c64, %c0_43] : memref<65x8xf32, #tpu.memory_space<vmem>>, vector<1x8xf32>
    %cst_44 = arith.constant dense<0.000000e+00> : vector<1x8xf32>
    %270 = tpu.matmul %267, %268, %cst_44 {dimension_numbers = #tpu.dot_dimension_numbers<[1], [0], [0], [1], [0, 0, 1, 1], [], []>} : vector<1x64xf32>, vector<64x8xf32>, vector<1x8xf32> -> vector<1x8xf32>
    %271 = arith.addf %270, %269 : vector<1x8xf32>
    %cst_45 = arith.constant 0.000000e+00 : f32
    %272 = vector.broadcast %cst_45 : f32 to vector<1x8xf32>
    %273 = arith.maximumf %271, %272 : vector<1x8xf32>
    %cst_46 = arith.constant dense<0xFF800000> : vector<1xf32>
    %274 = vector.multi_reduction <maximumf>, %273, %cst_46 [1] : vector<1x8xf32> to vector<1xf32>
    %275 = vector.shape_cast %274 : vector<1xf32> to vector<1x1xf32>
    %276 = vector.broadcast %275 : vector<1x1xf32> to vector<1x8xf32>
    %277 = arith.subf %273, %276 : vector<1x8xf32>
    %278 = math.exp %277 : vector<1x8xf32>
    %cst_47 = arith.constant dense<0.000000e+00> : vector<1xf32>
    %279 = vector.multi_reduction <add>, %278, %cst_47 [1] : vector<1x8xf32> to vector<1xf32>
    %280 = vector.shape_cast %279 : vector<1xf32> to vector<1x1xf32>
    %281 = math.log %280 : vector<1x1xf32>
    %282 = arith.addf %275, %281 : vector<1x1xf32>
    %283 = vector.broadcast %282 : vector<1x1xf32> to vector<1x8xf32>
    %284 = arith.subf %273, %283 : vector<1x8xf32>
    %c0_48 = arith.constant 0 : index
    %c0_49 = arith.constant 0 : index
    %285 = vector.load %arg3[%c0_48, %c0_49] : memref<1x8xf32, #tpu.memory_space<vmem>>, vector<1x8xf32>
    tpu.vector_store %arg3[%c0_48, %c0_49], %284 {strides = array<i32>} : memref<1x8xf32, #tpu.memory_space<vmem>>, vector<1x8xf32>,
    return
  }
}

</mosaic_0001>

<bundles_post_ra>
// kernel: tpu_custom_call.1
= control target key start
LH: loop header
LB: loop body
LE: loop exit
PB: predicated region body
PF: predicated region fallthrough
CT: control target
= control target key end

     0   :  { %8 = vsyncpa [#allocation3], 0  ;;  %s3171_s0 = inlined_call_operand.vmem [shape: f32[9,32], index: 0, kind: input, shape index: {}]   ;;  %s3172_s1 = inlined_call_operand.hbm [shape: f32[161,512], index: 1, kind: input, shape index: {}]   ;;  %s3173_s2 = inlined_call_operand.vmem [shape: f32[65,8], index: 2, kind: input, shape index: {}]   ;;  %s3174_s3 = inlined_call_operand.hbm [shape: f32[1,8], index: 3, kind: output, shape index: {}]  }
   0x1   :  { %9 = vsyncpa [#allocation4], 0  ;;  %s2650_s12 = smov [#allocation2]   ;;  %s2602_s16 = scalar_lea.hbm %s3172_s1, 10752 }
   0x2   :  { %s17_s13 = sshll.u32 %s2650_s12, 4  ;;  %p2603_p0 = scmp.ne.s32.totalorder %s3172_s1, %s2602_s16  ;;  %s18_s13 = int_to_ptr.vmem [resolvable:$true] %s17_s13 }
   0x3   :  { %p2606_p1 = scmp.lt.u32.totalorder %s2602_s16, %s3172_s1 }
   0x5   :  { %p2608_p2 = pnand %p2606_p1, %p2603_p0 }
   0x7   :  { %2611 = shalt.err (!%p2608_p2)
}
   0x8   :  { %s2612_s21 = scalar_lea.vmem %s18_s13, 10752  ;;  %p2617_p4 = scmp.lt.s32.totalorder %s18_s13, %s18_s13 }
   0x9   :  { %p2613_p3 = scmp.ne.s32.totalorder %s18_s13, %s2612_s21  ;;  %p2618_p5 = scmp.lt.s32.totalorder %s2612_s21, %s2612_s21 }
   0xb   :  { %p2619_p6 = por %p2618_p5, %p2617_p4 }
   0xd   :  { %p2620_p7 = pnand %p2619_p6, %p2613_p3 }
   0xf   :  { %2623 = shalt.err (!%p2620_p7)
}
  0x10   :  { %s2651_s22 = smov 512   ;;  %s2652_s23 = smov 32  }
  0x11   :  { %23 = dma.hbm_to_vmem [thread:$0]  %s3172_s1, 10752, %s18_s13, [#allocation3], %s2651_s22, %s2651_s22, %s2652_s23  }
  0x12   :  { %2646 = dma.done.wait [#allocation3], 10752  }
  0x13   :  { %2647 = vsyncadd [#allocation3], 4294956544  ;;  %v2653_v0 = vmov 0.0   ;;  %v30_v1 = vld [vmem:[#allocation2 + $0x8] sm:$0xff]  ;;  %v29_v3 = vld [vmem:[#allocation2] sm:$0xff]  ;;  %vm134_vm0 = vcmask 261120  }
  0x14   :  { %205 = vmatprep.mubr.f32.mxu1 %v2653_v0  ;;  %402 = vmatprep.mubr.f32.mxu0 %v2653_v0  ;;  %v34_v2 = vld [vmem:[#allocation2 + $0x28] sm:$0xff]  ;;  %v33_v5 = vld [vmem:[#allocation2 + $0x20] sm:$0xff]  ;;  %v32_v12 = vld [vmem:[#allocation2 + $0x18] sm:$0xff]  ;;  %vm2655_vm2 = vmmov 0   ;;  %s2656_s17 = smov 64   ;;  %vm1732_vm3 = vcmask 523264  }
  0x15   :  { %v1898_v4 = vpack.c.bf16 %v34_v2, %v30_v1  ;;  %v38_v6 = vld [vmem:[#allocation2 + $0x48] sm:$0xff]  ;;  %v1900_v8 = vpack.c.bf16 %v33_v5, %v29_v3  ;;  %v37_v10 = vld [vmem:[#allocation2 + $0x40] sm:$0xff]  ;;  %v36_v13 = vld [vmem:[#allocation2 + $0x38] sm:$0xff]  ;;  %vm1807_vm4 = vcmask 57344  }
  0x16   :  { %v42_v7 = vld [vmem:[#allocation2 + $0x68] sm:$0xff]  ;;  %v41_v11 = vld [vmem:[#allocation2 + $0x60] sm:$0xff]  ;;  %v1906_v15 = vpack.c.bf16 %v36_v13, %v32_v12  ;;  %v31_v16 = vld [vmem:[#allocation2 + $0x10] sm:$0xff] }
  0x17   :  { %v1902_v9 = vpack.c.bf16 %v42_v7, %v38_v6  ;;  %1899 = vmatprep.subr.bf16.mxu1 %v1898_v4  ;;  %v1904_v14 = vpack.c.bf16 %v41_v11, %v37_v10  ;;  %v35_v17 = vld [vmem:[#allocation2 + $0x30] sm:$0xff]  ;;  %v40_v18 = vld [vmem:[#allocation2 + $0x58] sm:$0xff]  ;;  %v111_v20 = vld [vmem:[%s3171_s0] sm:$0xff] }
  0x18   :  { %1901 = vmatpush1.bf16.msra.mxu1 %v1900_v8  ;;  %v44_v19 = vld [vmem:[#allocation2 + $0x78] sm:$0xff]  ;;  %v1908_v21 = vpack.c.bf16 %v35_v17, %v31_v16  ;;  %v39_v23 = vld [vmem:[#allocation2 + $0x50] sm:$0xff]  ;;  %v112_v25 = vld [vmem:[%s3171_s0 + $0x8] sm:$0x1] }
  0x19   :  { %1903 = vmatprep.subr.bf16.mxu1 %v1902_v9  ;;  %v1910_v22 = vpack.c.bf16 %v44_v19, %v40_v18  ;;  %v43_v24 = vld [vmem:[#allocation2 + $0x70] sm:$0xff]  ;;  %v46_v27 = vld [vmem:[#allocation2 + $0x88] sm:$0xff]  ;;  %v48_v29 = vld [vmem:[#allocation2 + $0x98] sm:$0xff] }
  0x1a   :  { %v1912_v26 = vpack.c.bf16 %v43_v24, %v39_v23  ;;  %v50_v28 = vld [vmem:[#allocation2 + $0xa8] sm:$0xff]  ;;  %v52_v31 = vld [vmem:[#allocation2 + $0xb8] sm:$0xff]  ;;  %v45_v32 = vld [vmem:[#allocation2 + $0x80] sm:$0xff] }
  0x1b   :  { %v2706_v30 = vpack.c.bf16 %v50_v28, %v46_v27  ;;  %v49_v33 = vld [vmem:[#allocation2 + $0xa0] sm:$0xff]  ;;  %v2708_v34 = vpack.c.bf16 %v52_v31, %v48_v29  ;;  %v47_v36 = vld [vmem:[#allocation2 + $0x90] sm:$0xff]  ;;  %v54_v38 = vld [vmem:[#allocation2 + $0xc8] sm:$0xff] }
  0x1c   :  { %1905 = vmatpush1.bf16.msra.mxu1 %v1904_v14  ;;  %v2710_v35 = vpack.c.bf16 %v49_v33, %v45_v32  ;;  %v51_v37 = vld [vmem:[#allocation2 + $0xb0] sm:$0xff]  ;;  %v58_v40 = vld [vmem:[#allocation2 + $0xe8] sm:$0xff]  ;;  %v56_v41 = vld [vmem:[#allocation2 + $0xd8] sm:$0xff] }
  0x1d   :  { %1907 = vmatprep.subr.bf16.mxu1 %v1906_v15  ;;  %1915 = vmatprep.subr.bf16.mxu0 %v2706_v30  ;;  %v2713_v39 = vpack.c.bf16 %v51_v37, %v47_v36  ;;  %v60_v42 = vld [vmem:[#allocation2 + $0xf8] sm:$0xff]  ;;  %v2717_v43 = vpack.c.bf16 %v58_v40, %v54_v38  ;;  %v53_v45 = vld [vmem:[#allocation2 + $0xc0] sm:$0xff]  ;;  %v55_v47 = vld [vmem:[#allocation2 + $0xd0] sm:$0xff] }
  0x1e   :  { %1917 = vmatpush1.bf16.msra.mxu0 %v2710_v35  ;;  %v2719_v44 = vpack.c.bf16 %v60_v42, %v56_v41  ;;  %v57_v46 = vld [vmem:[#allocation2 + $0xe0] sm:$0xff]  ;;  %v59_v49 = vld [vmem:[#allocation2 + $0xf0] sm:$0xff]  ;;  %v62_v50 = vld [vmem:[#allocation2 + $0x108] sm:$0xff] }
  0x1f   :  { %1837 = vmatmul.mubr.msk.f32.vlgmr.msra.gmra.mrb[0].mxu1 %vm134_vm0, %v111_v20  ;;  %v2722_v48 = vpack.c.bf16 %v57_v46, %v53_v45  ;;  %v66_v51 = vld [vmem:[#allocation2 + $0x128] sm:$0xff]  ;;  %1919 = vmatprep.subr.bf16.mxu0 %v2717_v43  ;;  %v2726_v52 = vpack.c.bf16 %v59_v49, %v55_v47  ;;  %v64_v54 = vld [vmem:[#allocation2 + $0x118] sm:$0xff]  ;;  %v61_v56 = vld [vmem:[#allocation2 + $0x100] sm:$0xff] }
  0x20   :  { %1909 = vmatpush1.bf16.msra.mxu1 %v1908_v21  ;;  %211 = vmatprep.mubr.f32.mxu1 %v2653_v0  ;;  %v2728_v53 = vpack.c.bf16 %v66_v51, %v62_v50  ;;  %v68_v55 = vld [vmem:[#allocation2 + $0x138] sm:$0xff]  ;;  %v65_v58 = vld [vmem:[#allocation2 + $0x120] sm:$0xff]  ;;  %v63_v59 = vld [vmem:[#allocation2 + $0x110] sm:$0xff] }
  0x21   :  { %1911 = vmatprep.subr.bf16.mxu1 %v1910_v22  ;;  %v2730_v57 = vpack.c.bf16 %v68_v55, %v64_v54  ;;  %v67_v60 = vld [vmem:[#allocation2 + $0x130] sm:$0xff]  ;;  %v2733_v61 = vpack.c.bf16 %v65_v58, %v61_v56  ;;  %v70_v62 = vld [vmem:[#allocation2 + $0x148] sm:$0xff]  ;;  %v72_v1 = vld [vmem:[#allocation2 + $0x158] sm:$0xff] }
  0x22   :  { %1921 = vmatpush1.bf16.msra.mxu0 %v2722_v48  ;;  %v74_v63 = vld [vmem:[#allocation2 + $0x168] sm:$0xff]  ;;  %v2737_v2 = vpack.c.bf16 %v67_v60, %v63_v59  ;;  %v76_v4 = vld [vmem:[#allocation2 + $0x178] sm:$0xff]  ;;  %v69_v5 = vld [vmem:[#allocation2 + $0x140] sm:$0xff] }
  0x23   :  { %1838 = vmatmul.mubr.msk.f32.gmra.mrb[2].mxu1 %vm134_vm0, %v112_v25  ;;  %1923 = vmatprep.subr.bf16.mxu0 %v2728_v53  ;;  %v2739_v3 = vpack.c.bf16 %v74_v63, %v70_v62  ;;  %v73_v6 = vld [vmem:[#allocation2 + $0x160] sm:$0xff]  ;;  %v2742_v7 = vpack.c.bf16 %v76_v4, %v72_v1  ;;  %v71_v8 = vld [vmem:[#allocation2 + $0x150] sm:$0xff]  ;;  %v78_v10 = vld [vmem:[#allocation2 + $0x188] sm:$0xff] }
  0x24   :  { %1913 = vmatpush1.bf16.msra.mxu1 %v1912_v26  ;;  %282 = vmatprep.mubr.f32.mxu1 %v2653_v0  ;;  %v75_v9 = vld [vmem:[#allocation2 + $0x170] sm:$0xff]  ;;  %v82_v11 = vld [vmem:[#allocation2 + $0x1a8] sm:$0xff]  ;;  %v80_v12 = vld [vmem:[#allocation2 + $0x198] sm:$0xff]  ;;  %v2745_v14 = vpack.c.bf16 %v73_v6, %v69_v5 }
  0x25   :  { %1947 = vmatprep.subr.bf16.mxu1 %v2708_v34  ;;  %v84_v13 = vld [vmem:[#allocation2 + $0x1b8] sm:$0xff]  ;;  %v2749_v15 = vpack.c.bf16 %v75_v9, %v71_v8  ;;  %v2751_v16 = vpack.c.bf16 %v82_v11, %v78_v10  ;;  %v77_v17 = vld [vmem:[#allocation2 + $0x180] sm:$0xff]  ;;  %v79_v19 = vld [vmem:[#allocation2 + $0x190] sm:$0xff]  ;;  %v114_v11 = vlaneseq }
  0x26   :  { %1925 = vmatpush1.bf16.msra.mxu0 %v2733_v61  ;;  %v81_v18 = vld [vmem:[#allocation2 + $0x1a0] sm:$0xff]  ;;  %v83_v21 = vld [vmem:[#allocation2 + $0x1b0] sm:$0xff]  ;;  %v86_v22 = vld [vmem:[#allocation2 + $0x1c8] sm:$0xff] }
  0x27   :  { %1839 = vmatmul.mubr.msk.f32.vlgmr.msra.gmra.mrb[4].mxu1 %vm134_vm0, %v111_v20  ;;  %1927 = vmatprep.subr.bf16.mxu0 %v2739_v3  ;;  %v2754_v20 = vpack.c.bf16 %v84_v13, %v80_v12  ;;  %v90_v23 = vld [vmem:[#allocation2 + $0x1e8] sm:$0xff]  ;;  %v88_v24 = vld [vmem:[#allocation2 + $0x1d8] sm:$0xff]  ;;  %v2757_v26 = vpack.c.bf16 %v81_v18, %v77_v17  ;;  %v2761_v27 = vpack.c.bf16 %v83_v21, %v79_v19  ;;  %v85_v29 = vld [vmem:[#allocation2 + $0x1c0] sm:$0xff]  ;;  %v115_v12 = vshrl.u32 %v114_v11, 7 }
  0x28   :  { %288 = vmatprep.mubr.f32.mxu1 %v2653_v0  ;;  %1949 = vmatpush1.bf16.msra.mxu1 %v2713_v39  ;;  %v2763_v28 = vpack.c.bf16 %v90_v23, %v86_v22  ;;  %v89_v31 = vld [vmem:[#allocation2 + $0x1e0] sm:$0xff]  ;;  %v87_v32 = vld [vmem:[#allocation2 + $0x1d0] sm:$0xff]  ;;  %v94_v37 = vld [vmem:[#allocation2 + $0x208] sm:$0xff] }
  0x29   :  { %1951 = vmatprep.subr.bf16.mxu1 %v2719_v44  ;;  %v91_v36 = vld [vmem:[#allocation2 + $0x1f0] sm:$0xff]  ;;  %v98_v38 = vld [vmem:[#allocation2 + $0x228] sm:$0xff]  ;;  %v96_v40 = vld [vmem:[#allocation2 + $0x218] sm:$0xff]  ;;  %v2769_v42 = vpack.c.bf16 %v89_v31, %v85_v29  ;;  %v116_v13 = vsub.s32 0, %v115_v12  ;;  %v120_v18 = vsub.s32 1, %v115_v12  ;;  %v128_v29 = vsub.s32 3, %v115_v12 }
  0x2a   :  { %1929 = vmatpush1.bf16.msra.mxu0 %v2745_v14  ;;  %v100_v41 = vld [vmem:[#allocation2 + $0x238] sm:$0xff]  ;;  %v2773_v45 = vpack.c.bf16 %v91_v36, %v87_v32  ;;  %v2775_v46 = vpack.c.bf16 %v98_v38, %v94_v37  ;;  %v93_v47 = vld [vmem:[#allocation2 + $0x200] sm:$0xff]  ;;  %v95_v50 = vld [vmem:[#allocation2 + $0x210] sm:$0xff]  ;;  %v124_v36 = vsub.s32 2, %v115_v12 }
  0x2b   :  { %1840 = vmatmul.mubr.msk.f32.gmra.mrb[6].mxu1 %vm134_vm0, %v112_v25  ;;  %v92_v25 = vld [vmem:[#allocation2 + $0x1f8] sm:$0xff]  ;;  %1931 = vmatprep.subr.bf16.mxu0 %v2751_v16  ;;  %v97_v49 = vld [vmem:[#allocation2 + $0x220] sm:$0xff]  ;;  %v2778_v51 = vpack.c.bf16 %v100_v41, %v96_v40  ;;  %v99_v54 = vld [vmem:[#allocation2 + $0x230] sm:$0xff] }
  0x2c   :  { %473 = vmatprep.mubr.f32.mxu1 %v2653_v0  ;;  %1953 = vmatpush1.bf16.msra.mxu1 %v2726_v52  ;;  %v2766_v33 = vpack.c.bf16 %v92_v25, %v88_v24  ;;  %v102_v55 = vld [vmem:[#allocation2 + $0x248] sm:$0xff]  ;;  %v104_v58 = vld [vmem:[#allocation2 + $0x258] sm:$0xff]  ;;  %v2781_v60 = vpack.c.bf16 %v97_v49, %v93_v47  ;;  %v2785_v62 = vpack.c.bf16 %v99_v54, %v95_v50  ;;  %v101_v1 = vld [vmem:[#allocation2 + $0x240] sm:$0xff] }
  0x2d   :  { %1955 = vmatprep.subr.bf16.mxu1 %v2730_v57  ;;  %v106_v56 = vld [vmem:[#allocation2 + $0x268] sm:$0xff]  ;;  %v108_v59 = vld [vmem:[#allocation2 + $0x278] sm:$0xff]  ;;  %v105_v4 = vld [vmem:[#allocation2 + $0x260] sm:$0xff] }
  0x2e   :  { %1933 = vmatpush1.bf16.msra.mxu0 %v2757_v26  ;;  %v2787_v63 = vpack.c.bf16 %v106_v56, %v102_v55  ;;  %v2790_v5 = vpack.c.bf16 %v108_v59, %v104_v58  ;;  %v103_v6 = vld [vmem:[#allocation2 + $0x250] sm:$0xff]  ;;  %v2793_v9 = vpack.c.bf16 %v105_v4, %v101_v1 }
  0x2f   :  { %1935 = vmatprep.subr.bf16.mxu0 %v2763_v28  ;;  %v107_v8 = vld [vmem:[#allocation2 + $0x270] sm:$0xff] }
  0x30   :  { %1957 = vmatpush1.bf16.msra.mxu1 %v2737_v2  ;;  %v2797_v10 = vpack.c.bf16 %v107_v8, %v103_v6  ;;  %v110_v17 = vld [vmem:[#allocation2 + $0x280] ss:$8 sm:$0xf]  ;;  %v320_v8 = vand.u32 127, %v114_v11 }
  0x31   :  { %1959 = vmatprep.subr.bf16.mxu1 %v2742_v7  ;;  %v117_v19 = vrot.slane %v110_v17, %v116_v13  ;;  %v121_v21 = vrot.slane %v110_v17, %v120_v18  ;;  %v2814_v47 = vrot.slane %v110_v17, %v128_v29  ;;  %v2816_v49 = vrot.slane %v110_v17, %v124_v36 }
  0x32   :  { %1937 = vmatpush1.bf16.msra.mxu0 %v2769_v42  ;;  %vm321_vm1 = vcmp.lt.s32.totalorder %v320_v8, 64 }
  0x33   :  { %1939 = vmatprep.subr.bf16.mxu0 %v2775_v46 }
  0x34   :  { %1961 = vmatpush1.bf16.msra.mxu1 %v2749_v15 }
  0x35   :  { %1963 = vmatprep.subr.bf16.mxu1 %v2754_v20 }
  0x36   :  { %1941 = vmatpush1.bf16.msra.mxu0 %v2781_v60 }
  0x37   :  { %1943 = vmatprep.subr.bf16.mxu0 %v2787_v63 }
  0x38   :  { %1965 = vmatpush1.bf16.msra.mxu1 %v2761_v27 }
  0x39   :  { %1967 = vmatprep.subr.bf16.mxu1 %v2766_v33 }
  0x3a   :  { %1945 = vmatpush1.bf16.msra.mxu0 %v2793_v9 }
  0x3b   :  { %1979 = vmatprep.subr.bf16.mxu0 %v2706_v30 }
  0x3c   :  { %1969 = vmatpush1.bf16.msra.mxu1 %v2773_v45 }
  0x3d   :  { %1971 = vmatprep.subr.bf16.mxu1 %v2778_v51 }
  0x40   :  { %1973 = vmatpush1.bf16.msra.mxu1 %v2785_v62 }
  0x41   :  { %1975 = vmatprep.subr.bf16.mxu1 %v2790_v5 }
  0x44   :  { %1977 = vmatpush1.bf16.msra.mxu1 %v2797_v10 }
  0x45   :  { %2011 = vmatprep.subr.bf16.mxu1 %v2708_v34 }
  0xf2   :  { %v207_v22 = vpop.f32.mrb[0].mxu1 }
  0xf3   :  { %v2804_v23 = vadd.f32 %v207_v22, %v117_v19  ;;  %v209_v24 = vpop.f32.mrb[1].mxu1 }
  0xf4   :  { %v2806_v25 = vadd.f32 %v209_v24, %v121_v21  ;;  %v1844_v24 = vsel %vm321_vm1, 1.0, %v2653_v0 }
  0xf5   :  { %v1841_v31 = vmul.f32 -1.442695, %v2804_v23  ;;  %v330_v11 = vrot.slane %v2804_v23, 1 }
  0xf6   :  { %v213_v32 = vpop.f32.mrb[2].mxu1  ;;  %v1842_v37 = vmul.f32 -1.442695, %v2806_v25 }
  0xf7   :  { %v2810_v38 = vadd.f32 %v213_v32, %v117_v19  ;;  %v215_v40 = vpop.f32.mrb[3].mxu1  ;;  %2454 = vpow2.f32 %v1841_v31 }
  0xf8   :  { %v2812_v41 = vadd.f32 %v215_v40, %v121_v21  ;;  %2456 = vpow2.f32 %v1842_v37 }
  0xfa   :  { %v284_v50 = vpop.f32.mrb[4].mxu1 }
  0xfb   :  { %v286_v54 = vpop.f32.mrb[5].mxu1  ;;  %v2822_v56 = vadd.f32 %v284_v50, %v2816_v49 }
  0xfc   :  { %v2819_v55 = vadd.f32 %v286_v54, %v2814_v47 }
  0xfd   :  { %v332_v50 = vrot.slane %v2822_v56, 1 }
  0xfe   :  { %v1843_v58 = vmul.f32 -1.442695, %v2819_v55 }
 0x100   :  { %2458 = vpow2.f32 %v1843_v58 }
 0x101   :  { %v2455_v59 = vpop.eup %2454  ;;  %2460 = vtanh.f32 %v2822_v56 }
 0x102   :  { %v2457_v1 = vpop.eup %2456  ;;  %v298_v4 = vadd.f32 1.0, %v2455_v59  ;;  %v331_v59 = vrot.slane %v2806_v25, 1 }
 0x103   :  { %v304_v6 = vadd.f32 1.0, %v2457_v1  ;;  %v333_v1 = vrot.slane %v2819_v55, 1 }
 0x104   :  { %2462 = vrcp.f32 %v298_v4 }
 0x105   :  { %2464 = vrcp.f32 %v304_v6 }
 0x10a   :  { %v2459_v12 = vpop.eup %2458 }
 0x10b   :  { %v2461_v13 = vpop.eup %2460  ;;  %v311_v18 = vadd.f32 1.0, %v2459_v12 }
 0x10d   :  { %2466 = vrcp.f32 %v311_v18 }
 0x10e   :  { %v2463_v17 = vpop.eup %2462 }
 0x10f   :  { %v2465_v19 = vpop.eup %2464  ;;  %v315_v21 = vmul.f32 %v2463_v17, %v2461_v13 }
 0x110   :  { %v314_v22 = vmul.f32 0.0, %v2465_v19 }
 0x112   :  { %v316_v29 = vadd.f32 %v315_v21, %v314_v22 }
 0x114   :  { %2468 = vtanh.f32 %v316_v29  ;;  %v2827_v31 = vmul.f32 %v1844_v24, %v316_v29 }
 0x117   :  { %v2467_v32 = vpop.eup %2466 }
 0x11e   :  { %v2469_v36 = vpop.eup %2468 }
 0x11f   :  { %v318_v37 = vmul.f32 %v2469_v36, %v2467_v32 }
 0x121   :  { %v324_v40 = vmul.f32 %v1844_v24, %v318_v37 }
 0x123   :  { %403 = vmatmul.mubr.f32.vlgmr.msra.gmra.mrb[0].mxu0 %v324_v40  ;;  %474 = vmatmul.mubr.f32.vlgmr.msra.gmra.mrb[8].mxu1 %v324_v40 }
 0x124   :  { %1981 = vmatpush1.bf16.msra.mxu0 %v2710_v35  ;;  %2013 = vmatpush1.bf16.msra.mxu1 %v2713_v39 }
 0x125   :  { %1983 = vmatprep.subr.bf16.mxu0 %v2717_v43  ;;  %2015 = vmatprep.subr.bf16.mxu1 %v2719_v44 }
 0x126   :  { %576 = vmatprep.mubr.f32.mxu0 %v2653_v0  ;;  %647 = vmatprep.mubr.f32.mxu1 %v2653_v0 }
 0x128   :  { %1985 = vmatpush1.bf16.msra.mxu0 %v2722_v48  ;;  %2017 = vmatpush1.bf16.msra.mxu1 %v2726_v52 }
 0x129   :  { %1987 = vmatprep.subr.bf16.mxu0 %v2728_v53  ;;  %2019 = vmatprep.subr.bf16.mxu1 %v2730_v57 }
 0x12c   :  { %1989 = vmatpush1.bf16.msra.mxu0 %v2733_v61  ;;  %2021 = vmatpush1.bf16.msra.mxu1 %v2737_v2 }
 0x12d   :  { %1991 = vmatprep.subr.bf16.mxu0 %v2739_v3  ;;  %2023 = vmatprep.subr.bf16.mxu1 %v2742_v7 }
 0x130   :  { %1993 = vmatpush1.bf16.msra.mxu0 %v2745_v14  ;;  %2025 = vmatpush1.bf16.msra.mxu1 %v2749_v15 }
 0x131   :  { %1995 = vmatprep.subr.bf16.mxu0 %v2751_v16  ;;  %2027 = vmatprep.subr.bf16.mxu1 %v2754_v20 }
 0x134   :  { %1997 = vmatpush1.bf16.msra.mxu0 %v2757_v26  ;;  %2029 = vmatpush1.bf16.msra.mxu1 %v2761_v27 }
 0x135   :  { %1999 = vmatprep.subr.bf16.mxu0 %v2763_v28  ;;  %2031 = vmatprep.subr.bf16.mxu1 %v2766_v33 }
 0x138   :  { %2001 = vmatpush1.bf16.msra.mxu0 %v2769_v42  ;;  %2033 = vmatpush1.bf16.msra.mxu1 %v2773_v45 }
 0x139   :  { %2003 = vmatprep.subr.bf16.mxu0 %v2775_v46  ;;  %2035 = vmatprep.subr.bf16.mxu1 %v2778_v51 }
 0x13c   :  { %2005 = vmatpush1.bf16.msra.mxu0 %v2781_v60  ;;  %2037 = vmatpush1.bf16.msra.mxu1 %v2785_v62 }
 0x13d   :  { %2007 = vmatprep.subr.bf16.mxu0 %v2787_v63  ;;  %2039 = vmatprep.subr.bf16.mxu1 %v2790_v5 }
 0x140   :  { %2009 = vmatpush1.bf16.msra.mxu0 %v2793_v9  ;;  %2041 = vmatpush1.bf16.msra.mxu1 %v2797_v10 }
 0x141   :  { %2043 = vmatprep.subr.bf16.mxu0 %v2706_v30  ;;  %2075 = vmatprep.subr.bf16.mxu1 %v2708_v34 }
 0x1f6   :  { %v404_v54 = vpop.f32.mrb[0].mxu0  ;;  %v475_v58 = vpop.f32.mrb[8].mxu1 }
 0x1f7   :  { %v405_v4 = vadd.f32 %v404_v54, %v330_v11  ;;  %v476_v6 = vadd.f32 %v475_v58, %v332_v50  ;;  %v406_v8 = vpop.f32.mrb[1].mxu0  ;;  %v477_v12 = vpop.f32.mrb[9].mxu1 }
 0x1f8   :  { %v407_v13 = vadd.f32 %v406_v8, %v331_v59  ;;  %v478_v17 = vadd.f32 %v477_v12, %v333_v1 }
 0x1f9   :  { %v1845_v18 = vmul.f32 -1.442695, %v405_v4 }
 0x1fa   :  { %v1846_v19 = vmul.f32 -1.442695, %v407_v13  ;;  %v1847_v21 = vmul.f32 -1.442695, %v478_v17  ;;  %v505_v17 = vrot.slane %v2806_v25, 2 }
 0x1fb   :  { %2470 = vpow2.f32 %v1845_v18  ;;  %v507_v18 = vrot.slane %v2819_v55, 2 }
 0x1fc   :  { %2472 = vpow2.f32 %v1846_v19 }
 0x1fd   :  { %2474 = vpow2.f32 %v1847_v21 }
 0x1fe   :  { %2476 = vtanh.f32 %v476_v6  ;;  %v506_v6 = vrot.slane %v2822_v56, 2 }
 0x205   :  { %v2471_v22 = vpop.eup %2470 }
 0x206   :  { %v2473_v24 = vpop.eup %2472  ;;  %v483_v29 = vadd.f32 1.0, %v2471_v22 }
 0x207   :  { %v489_v32 = vadd.f32 1.0, %v2473_v24  ;;  %v2475_v36 = vpop.eup %2474 }
 0x208   :  { %2478 = vrcp.f32 %v483_v29  ;;  %v2477_v37 = vpop.eup %2476  ;;  %v496_v54 = vadd.f32 1.0, %v2475_v36 }
 0x209   :  { %2480 = vrcp.f32 %v489_v32 }
 0x20a   :  { %2482 = vrcp.f32 %v496_v54 }
 0x212   :  { %v2479_v40 = vpop.eup %2478 }
 0x213   :  { %v2481_v11 = vpop.eup %2480  ;;  %v500_v50 = vmul.f32 %v2479_v40, %v2477_v37 }
 0x214   :  { %v499_v58 = vmul.f32 %v2481_v11, %v2827_v31  ;;  %v2483_v1 = vpop.eup %2482  ;;  %v504_v31 = vrot.slane %v2804_v23, 2 }
 0x216   :  { %v2868_v59 = vadd.f32 %v500_v50, %v499_v58 }
 0x218   :  { %2484 = vtanh.f32 %v2868_v59 }
 0x222   :  { %v2485_v4 = vpop.eup %2484 }
 0x223   :  { %v503_v8 = vmul.f32 %v2485_v4, %v2483_v1 }
 0x225   :  { %577 = vmatmul.mubr.f32.vlgmr.msra.gmra.mrb[2].mxu0 %v503_v8  ;;  %648 = vmatmul.mubr.f32.vlgmr.msra.gmra.mrb[10].mxu1 %v503_v8 }
 0x226   :  { %2045 = vmatpush1.bf16.msra.mxu0 %v2710_v35  ;;  %2077 = vmatpush1.bf16.msra.mxu1 %v2713_v39 }
 0x227   :  { %2047 = vmatprep.subr.bf16.mxu0 %v2717_v43  ;;  %2079 = vmatprep.subr.bf16.mxu1 %v2719_v44 }
 0x228   :  { %750 = vmatprep.mubr.f32.mxu0 %v2653_v0  ;;  %821 = vmatprep.mubr.f32.mxu1 %v2653_v0 }
 0x22a   :  { %2049 = vmatpush1.bf16.msra.mxu0 %v2722_v48  ;;  %2081 = vmatpush1.bf16.msra.mxu1 %v2726_v52 }
 0x22b   :  { %2051 = vmatprep.subr.bf16.mxu0 %v2728_v53  ;;  %2083 = vmatprep.subr.bf16.mxu1 %v2730_v57 }
 0x22e   :  { %2053 = vmatpush1.bf16.msra.mxu0 %v2733_v61  ;;  %2085 = vmatpush1.bf16.msra.mxu1 %v2737_v2 }
 0x22f   :  { %2055 = vmatprep.subr.bf16.mxu0 %v2739_v3  ;;  %2087 = vmatprep.subr.bf16.mxu1 %v2742_v7 }
 0x232   :  { %2057 = vmatpush1.bf16.msra.mxu0 %v2745_v14  ;;  %2089 = vmatpush1.bf16.msra.mxu1 %v2749_v15 }
 0x233   :  { %2059 = vmatprep.subr.bf16.mxu0 %v2751_v16  ;;  %2091 = vmatprep.subr.bf16.mxu1 %v2754_v20 }
 0x236   :  { %2061 = vmatpush1.bf16.msra.mxu0 %v2757_v26  ;;  %2093 = vmatpush1.bf16.msra.mxu1 %v2761_v27 }
 0x237   :  { %2063 = vmatprep.subr.bf16.mxu0 %v2763_v28  ;;  %2095 = vmatprep.subr.bf16.mxu1 %v2766_v33 }
 0x23a   :  { %2065 = vmatpush1.bf16.msra.mxu0 %v2769_v42  ;;  %2097 = vmatpush1.bf16.msra.mxu1 %v2773_v45 }
 0x23b   :  { %2067 = vmatprep.subr.bf16.mxu0 %v2775_v46  ;;  %2099 = vmatprep.subr.bf16.mxu1 %v2778_v51 }
 0x23e   :  { %2069 = vmatpush1.bf16.msra.mxu0 %v2781_v60  ;;  %2101 = vmatpush1.bf16.msra.mxu1 %v2785_v62 }
 0x23f   :  { %2071 = vmatprep.subr.bf16.mxu0 %v2787_v63  ;;  %2103 = vmatprep.subr.bf16.mxu1 %v2790_v5 }
 0x242   :  { %2073 = vmatpush1.bf16.msra.mxu0 %v2793_v9  ;;  %2105 = vmatpush1.bf16.msra.mxu1 %v2797_v10 }
 0x243   :  { %2107 = vmatprep.subr.bf16.mxu0 %v2706_v30  ;;  %2139 = vmatprep.subr.bf16.mxu1 %v2708_v34 }
 0x2f8   :  { %v578_v12 = vpop.f32.mrb[2].mxu0  ;;  %v649_v13 = vpop.f32.mrb[10].mxu1 }
 0x2f9   :  { %v579_v19 = vadd.f32 %v578_v12, %v504_v31  ;;  %v650_v21 = vadd.f32 %v649_v13, %v506_v6  ;;  %v580_v22 = vpop.f32.mrb[3].mxu0  ;;  %v651_v24 = vpop.f32.mrb[11].mxu1 }
 0x2fa   :  { %v581_v29 = vadd.f32 %v580_v22, %v505_v17  ;;  %v652_v32 = vadd.f32 %v651_v24, %v507_v18 }
 0x2fb   :  { %v1848_v36 = vmul.f32 -1.442695, %v579_v19 }
 0x2fc   :  { %v1849_v37 = vmul.f32 -1.442695, %v581_v29  ;;  %v1850_v40 = vmul.f32 -1.442695, %v652_v32  ;;  %v679_v32 = vrot.slane %v2806_v25, 3 }
 0x2fd   :  { %2486 = vpow2.f32 %v1848_v36  ;;  %v681_v36 = vrot.slane %v2819_v55, 3 }
 0x2fe   :  { %2488 = vpow2.f32 %v1849_v37 }
 0x2ff   :  { %2490 = vpow2.f32 %v1850_v40 }
 0x300   :  { %2492 = vtanh.f32 %v650_v21  ;;  %v680_v21 = vrot.slane %v2822_v56, 3 }
 0x307   :  { %v2487_v11 = vpop.eup %2486 }
 0x308   :  { %v2489_v50 = vpop.eup %2488  ;;  %v657_v54 = vadd.f32 1.0, %v2487_v11 }
 0x309   :  { %v663_v58 = vadd.f32 1.0, %v2489_v50  ;;  %v2491_v1 = vpop.eup %2490 }
 0x30a   :  { %2494 = vrcp.f32 %v657_v54  ;;  %v2493_v4 = vpop.eup %2492  ;;  %v670_v12 = vadd.f32 1.0, %v2491_v1 }
 0x30b   :  { %2496 = vrcp.f32 %v663_v58 }
 0x30c   :  { %2498 = vrcp.f32 %v670_v12 }
 0x314   :  { %v2495_v8 = vpop.eup %2494 }
 0x315   :  { %v2497_v31 = vpop.eup %2496  ;;  %v674_v6 = vmul.f32 %v2495_v8, %v2493_v4 }
 0x316   :  { %v673_v13 = vmul.f32 %v2497_v31, %v2868_v59  ;;  %v2499_v18 = vpop.eup %2498  ;;  %v678_v59 = vrot.slane %v2804_v23, 3 }
 0x318   :  { %v2910_v17 = vadd.f32 %v674_v6, %v673_v13 }
 0x31a   :  { %2500 = vtanh.f32 %v2910_v17 }
 0x324   :  { %v2501_v19 = vpop.eup %2500 }
 0x325   :  { %v677_v22 = vmul.f32 %v2501_v19, %v2499_v18 }
 0x327   :  { %751 = vmatmul.mubr.f32.vlgmr.msra.gmra.mrb[4].mxu0 %v677_v22  ;;  %822 = vmatmul.mubr.f32.vlgmr.msra.gmra.mrb[12].mxu1 %v677_v22 }
 0x328   :  { %2109 = vmatpush1.bf16.msra.mxu0 %v2710_v35  ;;  %2141 = vmatpush1.bf16.msra.mxu1 %v2713_v39 }
 0x329   :  { %2111 = vmatprep.subr.bf16.mxu0 %v2717_v43  ;;  %2143 = vmatprep.subr.bf16.mxu1 %v2719_v44 }
 0x32a   :  { %924 = vmatprep.mubr.f32.mxu0 %v2653_v0  ;;  %995 = vmatprep.mubr.f32.mxu1 %v2653_v0 }
 0x32c   :  { %2113 = vmatpush1.bf16.msra.mxu0 %v2722_v48  ;;  %2145 = vmatpush1.bf16.msra.mxu1 %v2726_v52 }
 0x32d   :  { %2115 = vmatprep.subr.bf16.mxu0 %v2728_v53  ;;  %2147 = vmatprep.subr.bf16.mxu1 %v2730_v57 }
 0x330   :  { %2117 = vmatpush1.bf16.msra.mxu0 %v2733_v61  ;;  %2149 = vmatpush1.bf16.msra.mxu1 %v2737_v2 }
 0x331   :  { %2119 = vmatprep.subr.bf16.mxu0 %v2739_v3  ;;  %2151 = vmatprep.subr.bf16.mxu1 %v2742_v7 }
 0x334   :  { %2121 = vmatpush1.bf16.msra.mxu0 %v2745_v14  ;;  %2153 = vmatpush1.bf16.msra.mxu1 %v2749_v15 }
 0x335   :  { %2123 = vmatprep.subr.bf16.mxu0 %v2751_v16  ;;  %2155 = vmatprep.subr.bf16.mxu1 %v2754_v20 }
 0x338   :  { %2125 = vmatpush1.bf16.msra.mxu0 %v2757_v26  ;;  %2157 = vmatpush1.bf16.msra.mxu1 %v2761_v27 }
 0x339   :  { %2127 = vmatprep.subr.bf16.mxu0 %v2763_v28  ;;  %2159 = vmatprep.subr.bf16.mxu1 %v2766_v33 }
 0x33c   :  { %2129 = vmatpush1.bf16.msra.mxu0 %v2769_v42  ;;  %2161 = vmatpush1.bf16.msra.mxu1 %v2773_v45 }
 0x33d   :  { %2131 = vmatprep.subr.bf16.mxu0 %v2775_v46  ;;  %2163 = vmatprep.subr.bf16.mxu1 %v2778_v51 }
 0x340   :  { %2133 = vmatpush1.bf16.msra.mxu0 %v2781_v60  ;;  %2165 = vmatpush1.bf16.msra.mxu1 %v2785_v62 }
 0x341   :  { %2135 = vmatprep.subr.bf16.mxu0 %v2787_v63  ;;  %2167 = vmatprep.subr.bf16.mxu1 %v2790_v5 }
 0x344   :  { %2137 = vmatpush1.bf16.msra.mxu0 %v2793_v9  ;;  %2169 = vmatpush1.bf16.msra.mxu1 %v2797_v10 }
 0x345   :  { %2171 = vmatprep.subr.bf16.mxu0 %v2706_v30  ;;  %2203 = vmatprep.subr.bf16.mxu1 %v2708_v34 }
 0x3fa   :  { %v752_v24 = vpop.f32.mrb[4].mxu0  ;;  %v823_v29 = vpop.f32.mrb[12].mxu1 }
 0x3fb   :  { %v753_v37 = vadd.f32 %v752_v24, %v678_v59  ;;  %v824_v40 = vadd.f32 %v823_v29, %v680_v21  ;;  %v754_v11 = vpop.f32.mrb[5].mxu0  ;;  %v825_v50 = vpop.f32.mrb[13].mxu1 }
 0x3fc   :  { %v755_v54 = vadd.f32 %v754_v11, %v679_v32  ;;  %v826_v58 = vadd.f32 %v825_v50, %v681_v36 }
 0x3fd   :  { %v1851_v1 = vmul.f32 -1.442695, %v753_v37 }
 0x3fe   :  { %v1852_v4 = vmul.f32 -1.442695, %v755_v54  ;;  %v1853_v8 = vmul.f32 -1.442695, %v826_v58  ;;  %v853_v58 = vrot.slane %v2806_v25, 4 }
 0x3ff   :  { %2502 = vpow2.f32 %v1851_v1  ;;  %v855_v1 = vrot.slane %v2819_v55, 4 }
 0x400   :  { %2504 = vpow2.f32 %v1852_v4 }
 0x401   :  { %2506 = vpow2.f32 %v1853_v8 }
 0x402   :  { %2508 = vtanh.f32 %v824_v40  ;;  %v854_v40 = vrot.slane %v2822_v56, 4 }
 0x409   :  { %v2503_v31 = vpop.eup %2502 }
 0x40a   :  { %v2505_v6 = vpop.eup %2504  ;;  %v831_v12 = vadd.f32 1.0, %v2503_v31 }
 0x40b   :  { %v837_v13 = vadd.f32 1.0, %v2505_v6  ;;  %v2507_v18 = vpop.eup %2506 }
 0x40c   :  { %2510 = vrcp.f32 %v831_v12  ;;  %v2509_v19 = vpop.eup %2508  ;;  %v844_v24 = vadd.f32 1.0, %v2507_v18 }
 0x40d   :  { %2512 = vrcp.f32 %v837_v13 }
 0x40e   :  { %2514 = vrcp.f32 %v844_v24 }
 0x416   :  { %v2511_v22 = vpop.eup %2510 }
 0x417   :  { %v2513_v59 = vpop.eup %2512  ;;  %v848_v21 = vmul.f32 %v2511_v22, %v2509_v19 }
 0x418   :  { %v847_v29 = vmul.f32 %v2513_v59, %v2910_v17  ;;  %v2515_v36 = vpop.eup %2514  ;;  %v852_v17 = vrot.slane %v2804_v23, 4 }
 0x41a   :  { %v2952_v32 = vadd.f32 %v848_v21, %v847_v29 }
 0x41c   :  { %2516 = vtanh.f32 %v2952_v32 }
 0x426   :  { %v2517_v37 = vpop.eup %2516 }
 0x427   :  { %v851_v11 = vmul.f32 %v2517_v37, %v2515_v36 }
 0x429   :  { %925 = vmatmul.mubr.f32.vlgmr.msra.gmra.mrb[6].mxu0 %v851_v11  ;;  %996 = vmatmul.mubr.f32.vlgmr.msra.gmra.mrb[14].mxu1 %v851_v11 }
 0x42a   :  { %2173 = vmatpush1.bf16.msra.mxu0 %v2710_v35  ;;  %2205 = vmatpush1.bf16.msra.mxu1 %v2713_v39 }
 0x42b   :  { %2175 = vmatprep.subr.bf16.mxu0 %v2717_v43  ;;  %2207 = vmatprep.subr.bf16.mxu1 %v2719_v44 }
 0x42c   :  { %1098 = vmatprep.mubr.f32.mxu0 %v2653_v0  ;;  %1169 = vmatprep.mubr.f32.mxu1 %v2653_v0 }
 0x42e   :  { %2177 = vmatpush1.bf16.msra.mxu0 %v2722_v48  ;;  %2209 = vmatpush1.bf16.msra.mxu1 %v2726_v52 }
 0x42f   :  { %2179 = vmatprep.subr.bf16.mxu0 %v2728_v53  ;;  %2211 = vmatprep.subr.bf16.mxu1 %v2730_v57 }
 0x432   :  { %2181 = vmatpush1.bf16.msra.mxu0 %v2733_v61  ;;  %2213 = vmatpush1.bf16.msra.mxu1 %v2737_v2 }
 0x433   :  { %2183 = vmatprep.subr.bf16.mxu0 %v2739_v3  ;;  %2215 = vmatprep.subr.bf16.mxu1 %v2742_v7 }
 0x436   :  { %2185 = vmatpush1.bf16.msra.mxu0 %v2745_v14  ;;  %2217 = vmatpush1.bf16.msra.mxu1 %v2749_v15 }
 0x437   :  { %2187 = vmatprep.subr.bf16.mxu0 %v2751_v16  ;;  %2219 = vmatprep.subr.bf16.mxu1 %v2754_v20 }
 0x43a   :  { %2189 = vmatpush1.bf16.msra.mxu0 %v2757_v26  ;;  %2221 = vmatpush1.bf16.msra.mxu1 %v2761_v27 }
 0x43b   :  { %2191 = vmatprep.subr.bf16.mxu0 %v2763_v28  ;;  %2223 = vmatprep.subr.bf16.mxu1 %v2766_v33 }
 0x43e   :  { %2193 = vmatpush1.bf16.msra.mxu0 %v2769_v42  ;;  %2225 = vmatpush1.bf16.msra.mxu1 %v2773_v45 }
 0x43f   :  { %2195 = vmatprep.subr.bf16.mxu0 %v2775_v46  ;;  %2227 = vmatprep.subr.bf16.mxu1 %v2778_v51 }
 0x442   :  { %2197 = vmatpush1.bf16.msra.mxu0 %v2781_v60  ;;  %2229 = vmatpush1.bf16.msra.mxu1 %v2785_v62 }
 0x443   :  { %2199 = vmatprep.subr.bf16.mxu0 %v2787_v63  ;;  %2231 = vmatprep.subr.bf16.mxu1 %v2790_v5 }
 0x446   :  { %2201 = vmatpush1.bf16.msra.mxu0 %v2793_v9  ;;  %2233 = vmatpush1.bf16.msra.mxu1 %v2797_v10 }
 0x447   :  { %2235 = vmatprep.subr.bf16.mxu0 %v2706_v30  ;;  %2267 = vmatprep.subr.bf16.mxu1 %v2708_v34 }
 0x4fc   :  { %v926_v50 = vpop.f32.mrb[6].mxu0  ;;  %v997_v54 = vpop.f32.mrb[14].mxu1 }
 0x4fd   :  { %v927_v4 = vadd.f32 %v926_v50, %v852_v17  ;;  %v998_v8 = vadd.f32 %v997_v54, %v854_v40  ;;  %v928_v31 = vpop.f32.mrb[7].mxu0  ;;  %v999_v6 = vpop.f32.mrb[15].mxu1 }
 0x4fe   :  { %v929_v12 = vadd.f32 %v928_v31, %v853_v58  ;;  %v1000_v13 = vadd.f32 %v999_v6, %v855_v1 }
 0x4ff   :  { %v1854_v18 = vmul.f32 -1.442695, %v927_v4 }
 0x500   :  { %v1855_v19 = vmul.f32 -1.442695, %v929_v12  ;;  %v1856_v22 = vmul.f32 -1.442695, %v1000_v13  ;;  %v1027_v13 = vrot.slane %v2806_v25, 5 }
 0x501   :  { %2518 = vpow2.f32 %v1854_v18  ;;  %v1029_v18 = vrot.slane %v2819_v55, 5 }
 0x502   :  { %2520 = vpow2.f32 %v1855_v19 }
 0x503   :  { %2522 = vpow2.f32 %v1856_v22 }
 0x504   :  { %2524 = vtanh.f32 %v998_v8  ;;  %v1028_v8 = vrot.slane %v2822_v56, 5 }
 0x50b   :  { %v2519_v59 = vpop.eup %2518 }
 0x50c   :  { %v2521_v21 = vpop.eup %2520  ;;  %v1005_v24 = vadd.f32 1.0, %v2519_v59 }
 0x50d   :  { %v1011_v29 = vadd.f32 1.0, %v2521_v21  ;;  %v2523_v36 = vpop.eup %2522 }
 0x50e   :  { %2526 = vrcp.f32 %v1005_v24  ;;  %v2525_v37 = vpop.eup %2524  ;;  %v1018_v50 = vadd.f32 1.0, %v2523_v36 }
 0x50f   :  { %2528 = vrcp.f32 %v1011_v29 }
 0x510   :  { %2530 = vrcp.f32 %v1018_v50 }
 0x518   :  { %v2527_v11 = vpop.eup %2526 }
 0x519   :  { %v2529_v17 = vpop.eup %2528  ;;  %v1022_v40 = vmul.f32 %v2527_v11, %v2525_v37 }
 0x51a   :  { %v1021_v54 = vmul.f32 %v2529_v17, %v2952_v32  ;;  %v2531_v1 = vpop.eup %2530  ;;  %v1026_v32 = vrot.slane %v2804_v23, 5 }
 0x51c   :  { %v2994_v58 = vadd.f32 %v1022_v40, %v1021_v54 }
 0x51e   :  { %2532 = vtanh.f32 %v2994_v58 }
 0x528   :  { %v2533_v4 = vpop.eup %2532 }
 0x529   :  { %v1025_v31 = vmul.f32 %v2533_v4, %v2531_v1 }
 0x52b   :  { %1099 = vmatmul.mubr.f32.vlgmr.msra.gmra.mrb[8].mxu0 %v1025_v31  ;;  %1170 = vmatmul.mubr.f32.vlgmr.msra.gmra.mrb[16].mxu1 %v1025_v31 }
 0x52c   :  { %2237 = vmatpush1.bf16.msra.mxu0 %v2710_v35  ;;  %2269 = vmatpush1.bf16.msra.mxu1 %v2713_v39 }
 0x52d   :  { %2239 = vmatprep.subr.bf16.mxu0 %v2717_v43  ;;  %2271 = vmatprep.subr.bf16.mxu1 %v2719_v44 }
 0x52e   :  { %1272 = vmatprep.mubr.f32.mxu0 %v2653_v0  ;;  %1343 = vmatprep.mubr.f32.mxu1 %v2653_v0 }
 0x530   :  { %2241 = vmatpush1.bf16.msra.mxu0 %v2722_v48  ;;  %2273 = vmatpush1.bf16.msra.mxu1 %v2726_v52 }
 0x531   :  { %2243 = vmatprep.subr.bf16.mxu0 %v2728_v53  ;;  %2275 = vmatprep.subr.bf16.mxu1 %v2730_v57 }
 0x534   :  { %2245 = vmatpush1.bf16.msra.mxu0 %v2733_v61  ;;  %2277 = vmatpush1.bf16.msra.mxu1 %v2737_v2 }
 0x535   :  { %2247 = vmatprep.subr.bf16.mxu0 %v2739_v3  ;;  %2279 = vmatprep.subr.bf16.mxu1 %v2742_v7 }
 0x538   :  { %2249 = vmatpush1.bf16.msra.mxu0 %v2745_v14  ;;  %2281 = vmatpush1.bf16.msra.mxu1 %v2749_v15 }
 0x539   :  { %2251 = vmatprep.subr.bf16.mxu0 %v2751_v16  ;;  %2283 = vmatprep.subr.bf16.mxu1 %v2754_v20 }
 0x53c   :  { %2253 = vmatpush1.bf16.msra.mxu0 %v2757_v26  ;;  %2285 = vmatpush1.bf16.msra.mxu1 %v2761_v27 }
 0x53d   :  { %2255 = vmatprep.subr.bf16.mxu0 %v2763_v28  ;;  %2287 = vmatprep.subr.bf16.mxu1 %v2766_v33 }
 0x540   :  { %2257 = vmatpush1.bf16.msra.mxu0 %v2769_v42  ;;  %2289 = vmatpush1.bf16.msra.mxu1 %v2773_v45 }
 0x541   :  { %2259 = vmatprep.subr.bf16.mxu0 %v2775_v46  ;;  %2291 = vmatprep.subr.bf16.mxu1 %v2778_v51 }
 0x544   :  { %2261 = vmatpush1.bf16.msra.mxu0 %v2781_v60  ;;  %2293 = vmatpush1.bf16.msra.mxu1 %v2785_v62 }
 0x545   :  { %2263 = vmatprep.subr.bf16.mxu0 %v2787_v63  ;;  %2295 = vmatprep.subr.bf16.mxu1 %v2790_v5 }
 0x548   :  { %2265 = vmatpush1.bf16.msra.mxu0 %v2793_v9  ;;  %2297 = vmatpush1.bf16.msra.mxu1 %v2797_v10 }
 0x549   :  { %2299 = vmatprep.subr.bf16.mxu0 %v2706_v30  ;;  %2331 = vmatprep.subr.bf16.mxu1 %v2708_v34 }
 0x5fe   :  { %v1100_v6 = vpop.f32.mrb[8].mxu0  ;;  %v1171_v12 = vpop.f32.mrb[16].mxu1 }
 0x5ff   :  { %v1101_v19 = vadd.f32 %v1100_v6, %v1026_v32  ;;  %v1172_v22 = vadd.f32 %v1171_v12, %v1028_v8  ;;  %v1102_v59 = vpop.f32.mrb[9].mxu0  ;;  %v1173_v21 = vpop.f32.mrb[17].mxu1 }
 0x600   :  { %v1103_v24 = vadd.f32 %v1102_v59, %v1027_v13  ;;  %v1174_v29 = vadd.f32 %v1173_v21, %v1029_v18 }
 0x601   :  { %v1857_v36 = vmul.f32 -1.442695, %v1101_v19 }
 0x602   :  { %v1858_v37 = vmul.f32 -1.442695, %v1103_v24  ;;  %v1859_v11 = vmul.f32 -1.442695, %v1174_v29  ;;  %v1201_v29 = vrot.slane %v2806_v25, 6 }
 0x603   :  { %2534 = vpow2.f32 %v1857_v36  ;;  %v1203_v36 = vrot.slane %v2819_v55, 6 }
 0x604   :  { %2536 = vpow2.f32 %v1858_v37 }
 0x605   :  { %2538 = vpow2.f32 %v1859_v11 }
 0x606   :  { %2540 = vtanh.f32 %v1172_v22  ;;  %v1202_v22 = vrot.slane %v2822_v56, 6 }
 0x60d   :  { %v2535_v17 = vpop.eup %2534 }
 0x60e   :  { %v2537_v40 = vpop.eup %2536  ;;  %v1179_v50 = vadd.f32 1.0, %v2535_v17 }
 0x60f   :  { %v1185_v54 = vadd.f32 1.0, %v2537_v40  ;;  %v2539_v1 = vpop.eup %2538 }
 0x610   :  { %2542 = vrcp.f32 %v1179_v50  ;;  %v2541_v4 = vpop.eup %2540  ;;  %v1192_v6 = vadd.f32 1.0, %v2539_v1 }
 0x611   :  { %2544 = vrcp.f32 %v1185_v54 }
 0x612   :  { %2546 = vrcp.f32 %v1192_v6 }
 0x61a   :  { %v2543_v31 = vpop.eup %2542 }
 0x61b   :  { %v2545_v32 = vpop.eup %2544  ;;  %v1196_v8 = vmul.f32 %v2543_v31, %v2541_v4 }
 0x61c   :  { %v1195_v12 = vmul.f32 %v2545_v32, %v2994_v58  ;;  %v2547_v18 = vpop.eup %2546  ;;  %v1200_v58 = vrot.slane %v2804_v23, 6 }
 0x61e   :  { %v3036_v13 = vadd.f32 %v1196_v8, %v1195_v12 }
 0x620   :  { %2548 = vtanh.f32 %v3036_v13 }
 0x62a   :  { %v2549_v19 = vpop.eup %2548 }
 0x62b   :  { %v1199_v59 = vmul.f32 %v2549_v19, %v2547_v18 }
 0x62d   :  { %1273 = vmatmul.mubr.f32.vlgmr.msra.gmra.mrb[10].mxu0 %v1199_v59  ;;  %1344 = vmatmul.mubr.f32.vlgmr.msra.gmra.mrb[18].mxu1 %v1199_v59 }
 0x62e   :  { %2301 = vmatpush1.bf16.msra.mxu0 %v2710_v35  ;;  %2333 = vmatpush1.bf16.msra.mxu1 %v2713_v39 }
 0x62f   :  { %2303 = vmatprep.subr.bf16.mxu0 %v2717_v43  ;;  %2335 = vmatprep.subr.bf16.mxu1 %v2719_v44 }
 0x630   :  { %1446 = vmatprep.mubr.f32.mxu0 %v2653_v0  ;;  %1517 = vmatprep.mubr.f32.mxu1 %v2653_v0 }
 0x632   :  { %2305 = vmatpush1.bf16.msra.mxu0 %v2722_v48  ;;  %2337 = vmatpush1.bf16.msra.mxu1 %v2726_v52 }
 0x633   :  { %2307 = vmatprep.subr.bf16.mxu0 %v2728_v53  ;;  %2339 = vmatprep.subr.bf16.mxu1 %v2730_v57 }
 0x636   :  { %2309 = vmatpush1.bf16.msra.mxu0 %v2733_v61  ;;  %2341 = vmatpush1.bf16.msra.mxu1 %v2737_v2 }
 0x637   :  { %2311 = vmatprep.subr.bf16.mxu0 %v2739_v3  ;;  %2343 = vmatprep.subr.bf16.mxu1 %v2742_v7 }
 0x63a   :  { %2313 = vmatpush1.bf16.msra.mxu0 %v2745_v14  ;;  %2345 = vmatpush1.bf16.msra.mxu1 %v2749_v15 }
 0x63b   :  { %2315 = vmatprep.subr.bf16.mxu0 %v2751_v16  ;;  %2347 = vmatprep.subr.bf16.mxu1 %v2754_v20 }
 0x63e   :  { %2317 = vmatpush1.bf16.msra.mxu0 %v2757_v26  ;;  %2349 = vmatpush1.bf16.msra.mxu1 %v2761_v27 }
 0x63f   :  { %2319 = vmatprep.subr.bf16.mxu0 %v2763_v28  ;;  %2351 = vmatprep.subr.bf16.mxu1 %v2766_v33 }
 0x642   :  { %2321 = vmatpush1.bf16.msra.mxu0 %v2769_v42  ;;  %2353 = vmatpush1.bf16.msra.mxu1 %v2773_v45 }
 0x643   :  { %2323 = vmatprep.subr.bf16.mxu0 %v2775_v46  ;;  %2355 = vmatprep.subr.bf16.mxu1 %v2778_v51 }
 0x646   :  { %2325 = vmatpush1.bf16.msra.mxu0 %v2781_v60  ;;  %2357 = vmatpush1.bf16.msra.mxu1 %v2785_v62 }
 0x647   :  { %2327 = vmatprep.subr.bf16.mxu0 %v2787_v63  ;;  %2359 = vmatprep.subr.bf16.mxu1 %v2790_v5 }
 0x64a   :  { %2329 = vmatpush1.bf16.msra.mxu0 %v2793_v9  ;;  %2361 = vmatpush1.bf16.msra.mxu1 %v2797_v10 }
 0x64b   :  { %2363 = vmatprep.subr.bf16.mxu0 %v2706_v30  ;;  %2395 = vmatprep.subr.bf16.mxu1 %v2708_v34 }
 0x700   :  { %v1274_v21 = vpop.f32.mrb[10].mxu0  ;;  %v1345_v24 = vpop.f32.mrb[18].mxu1 }
 0x701   :  { %v1275_v37 = vadd.f32 %v1274_v21, %v1200_v58  ;;  %v1346_v11 = vadd.f32 %v1345_v24, %v1202_v22  ;;  %v1276_v17 = vpop.f32.mrb[11].mxu0  ;;  %v1347_v40 = vpop.f32.mrb[19].mxu1 }
 0x702   :  { %v1277_v50 = vadd.f32 %v1276_v17, %v1201_v29  ;;  %v1348_v54 = vadd.f32 %v1347_v40, %v1203_v36  ;;  %v1727_v17 = vld [vmem:[%s3173_s2 + $0x20] sm:$0xff]  ;;  %v1728_v40 = vld [vmem:[%s3173_s2 + $0x28] sm:$0xff] }
 0x703   :  { %v1860_v1 = vmul.f32 -1.442695, %v1275_v37  ;;  %v1726_v37 = vld [vmem:[%s3173_s2 + $0x18] sm:$0xff] }
 0x704   :  { %v1861_v30 = vmul.f32 -1.442695, %v1277_v50  ;;  %v1862_v34 = vmul.f32 -1.442695, %v1348_v54  ;;  %v2433_v50 = vpack.c.bf16 %v1728_v40, %v1727_v17 }
 0x705   :  { %2550 = vpow2.f32 %v1860_v1 }
 0x706   :  { %2552 = vpow2.f32 %v1861_v30 }
 0x707   :  { %2554 = vpow2.f32 %v1862_v34 }
 0x708   :  { %2556 = vtanh.f32 %v1346_v11 }
 0x70f   :  { %v2551_v4 = vpop.eup %2550 }
 0x710   :  { %v2553_v31 = vpop.eup %2552  ;;  %v1353_v32 = vadd.f32 1.0, %v2551_v4 }
 0x711   :  { %v1359_v8 = vadd.f32 1.0, %v2553_v31  ;;  %v2555_v6 = vpop.eup %2554 }
 0x712   :  { %2558 = vrcp.f32 %v1353_v32  ;;  %v2557_v12 = vpop.eup %2556  ;;  %v1366_v58 = vadd.f32 1.0, %v2555_v6 }
 0x713   :  { %2560 = vrcp.f32 %v1359_v8 }
 0x714   :  { %2562 = vrcp.f32 %v1366_v58 }
 0x71c   :  { %v2559_v18 = vpop.eup %2558 }
 0x71d   :  { %v2561_v19 = vpop.eup %2560  ;;  %v1370_v59 = vmul.f32 %v2559_v18, %v2557_v12 }
 0x71e   :  { %v1369_v22 = vmul.f32 %v2561_v19, %v3036_v13  ;;  %v2563_v24 = vpop.eup %2562 }
 0x720   :  { %v3078_v21 = vadd.f32 %v1370_v59, %v1369_v22 }
 0x722   :  { %2564 = vtanh.f32 %v3078_v21 }
 0x72c   :  { %v2565_v29 = vpop.eup %2564 }
 0x72d   :  { %v3081_v36 = vmul.f32 %v2565_v29, %v2563_v24 }
 0x72f   :  { %1447 = vmatmul.mubr.f32.vlgmr.msra.gmra.mrb[12].mxu0 %v3081_v36  ;;  %1518 = vmatmul.mubr.f32.vlgmr.msra.gmra.mrb[20].mxu1 %v3081_v36 }
 0x730   :  { %2365 = vmatpush1.bf16.msra.mxu0 %v2710_v35  ;;  %2397 = vmatpush1.bf16.msra.mxu1 %v2713_v39  ;;  %v1374_v35 = vrot.slane %v2804_v23, 7  ;;  %v1376_v39 = vrot.slane %v2822_v56, 7  ;;  %v1723_v23 = vld [vmem:[%s3173_s2] sm:$0xff]  ;;  %v2654_v56 = vmov 0.0|0.0  }
 0x731   :  { %2367 = vmatprep.subr.bf16.mxu0 %v2717_v43  ;;  %2399 = vmatprep.subr.bf16.mxu1 %v2719_v44 }
 0x732   :  { %1612 = vmatprep.mubr.f32.mxu0 %v2653_v0  ;;  %1683 = vmatprep.mubr.f32.mxu1 %v2653_v0 }
 0x734   :  { %2369 = vmatpush1.bf16.msra.mxu0 %v2722_v48  ;;  %2401 = vmatpush1.bf16.msra.mxu1 %v2726_v52  ;;  %v1375_v48 = vrot.slane %v2806_v25, 7  ;;  %v1377_v52 = vrot.slane %v2819_v55, 7  ;;  %v1724_v25 = vld [vmem:[%s3173_s2 + $0x8] sm:$0xff]  ;;  %v1725_v55 = vld [vmem:[%s3173_s2 + $0x10] sm:$0xff] }
 0x735   :  { %2371 = vmatprep.subr.bf16.mxu0 %v2728_v53  ;;  %2403 = vmatprep.subr.bf16.mxu1 %v2730_v57  ;;  %v2427_v13 = vpack.c.bf16 %v1724_v25, %v1723_v23  ;;  %v2430_v11 = vpack.c.bf16 %v1726_v37, %v1725_v55 }
 0x738   :  { %2373 = vmatpush1.bf16.msra.mxu0 %v2733_v61  ;;  %2405 = vmatpush1.bf16.msra.mxu1 %v2737_v2 }
 0x739   :  { %2375 = vmatprep.subr.bf16.mxu0 %v2739_v3  ;;  %2407 = vmatprep.subr.bf16.mxu1 %v2742_v7 }
 0x73c   :  { %2377 = vmatpush1.bf16.msra.mxu0 %v2745_v14  ;;  %2409 = vmatpush1.bf16.msra.mxu1 %v2749_v15 }
 0x73d   :  { %2379 = vmatprep.subr.bf16.mxu0 %v2751_v16  ;;  %2411 = vmatprep.subr.bf16.mxu1 %v2754_v20 }
 0x740   :  { %2381 = vmatpush1.bf16.msra.mxu0 %v2757_v26  ;;  %2413 = vmatpush1.bf16.msra.mxu1 %v2761_v27 }
 0x741   :  { %2383 = vmatprep.subr.bf16.mxu0 %v2763_v28  ;;  %2415 = vmatprep.subr.bf16.mxu1 %v2766_v33 }
 0x744   :  { %2385 = vmatpush1.bf16.msra.mxu0 %v2769_v42  ;;  %2417 = vmatpush1.bf16.msra.mxu1 %v2773_v45 }
 0x745   :  { %2387 = vmatprep.subr.bf16.mxu0 %v2775_v46  ;;  %2419 = vmatprep.subr.bf16.mxu1 %v2778_v51 }
 0x748   :  { %2389 = vmatpush1.bf16.msra.mxu0 %v2781_v60  ;;  %2421 = vmatpush1.bf16.msra.mxu1 %v2785_v62 }
 0x749   :  { %2391 = vmatprep.subr.bf16.mxu0 %v2787_v63  ;;  %2423 = vmatprep.subr.bf16.mxu1 %v2790_v5 }
 0x74c   :  { %2393 = vmatpush1.bf16.msra.mxu0 %v2793_v9  ;;  %2425 = vmatpush1.bf16.msra.mxu1 %v2797_v10 }
 0x74d   :  { %2426 = vmatprep.subr.bf16.mxu0 %v2654_v56 }
 0x802   :  { %v1448_v43 = vpop.f32.mrb[12].mxu0  ;;  %v1519_v44 = vpop.f32.mrb[20].mxu1 }
 0x803   :  { %v1449_v53 = vadd.f32 %v1448_v43, %v1374_v35  ;;  %v1520_v57 = vadd.f32 %v1519_v44, %v1376_v39  ;;  %v1450_v61 = vpop.f32.mrb[13].mxu0  ;;  %v1521_v2 = vpop.f32.mrb[21].mxu1 }
 0x804   :  { %v1451_v3 = vadd.f32 %v1450_v61, %v1375_v48  ;;  %v1522_v7 = vadd.f32 %v1521_v2, %v1377_v52 }
 0x805   :  { %v1863_v14 = vmul.f32 -1.442695, %v1449_v53 }
 0x806   :  { %v1864_v15 = vmul.f32 -1.442695, %v1451_v3  ;;  %v1865_v16 = vmul.f32 -1.442695, %v1522_v7  ;;  %v1731_v3 = vld [vmem:[%s3173_s2 + $0x40] sm:$0x1] }
 0x807   :  { %2566 = vpow2.f32 %v1863_v14 }
 0x808   :  { %2568 = vpow2.f32 %v1864_v15 }
 0x809   :  { %2570 = vpow2.f32 %v1865_v16 }
 0x80a   :  { %2572 = vtanh.f32 %v1520_v57 }
 0x811   :  { %v2567_v20 = vpop.eup %2566 }
 0x812   :  { %v2569_v26 = vpop.eup %2568  ;;  %v1527_v27 = vadd.f32 1.0, %v2567_v20 }
 0x813   :  { %v1533_v28 = vadd.f32 1.0, %v2569_v26  ;;  %v2571_v33 = vpop.eup %2570 }
 0x814   :  { %2574 = vrcp.f32 %v1527_v27  ;;  %v2573_v42 = vpop.eup %2572  ;;  %v1540_v60 = vadd.f32 1.0, %v2571_v33 }
 0x815   :  { %2576 = vrcp.f32 %v1533_v28 }
 0x816   :  { %2578 = vrcp.f32 %v1540_v60 }
 0x81e   :  { %v2575_v45 = vpop.eup %2574 }
 0x81f   :  { %v2577_v46 = vpop.eup %2576  ;;  %v1544_v51 = vmul.f32 %v2575_v45, %v2573_v42 }
 0x820   :  { %v1543_v62 = vmul.f32 %v2577_v46, %v3078_v21  ;;  %v2579_v5 = vpop.eup %2578 }
 0x822   :  { %v1545_v63 = vadd.f32 %v1544_v51, %v1543_v62 }
 0x824   :  { %2580 = vtanh.f32 %v1545_v63 }
 0x82e   :  { %v2581_v9 = vpop.eup %2580 }
 0x82f   :  { %v1547_v10 = vmul.f32 %v2581_v9, %v2579_v5 }
 0x831   :  { %1613 = vmatmul.mubr.f32.vlgmr.msra.gmra.mrb[14].mxu0 %v1547_v10  ;;  %1684 = vmatmul.mubr.f32.vlgmr.msra.gmra.mrb[6].mxu1 %v1547_v10 }
 0x832   :  { %2428 = vmatpush3.bf16.msra.mxu0 %v2427_v13  ;;  %1895 = vmatprep.mubr.msk.f32.mxu0 %vm2655_vm2, %v2653_v0 }
 0x833   :  { %2429 = vmatprep.subr.bf16.mxu0 %v2654_v56 }
 0x836   :  { %2431 = vmatpush3.bf16.msra.mxu0 %v2430_v11 }
 0x837   :  { %2432 = vmatprep.subr.bf16.mxu0 %v2654_v56 }
 0x83a   :  { %2434 = vmatpush3.bf16.msra.mxu0 %v2433_v50 }
 0x83b   :  { %2435 = vmatprep.subr.bf16.mxu0 %v2654_v56 }
 0x904   :  { %v1614_v54 = vpop.f32.mrb[14].mxu0  ;;  %v1685_v1 = vpop.f32.mrb[6].mxu1 }
 0x905   :  { %v1615_v30 = vadd.f32 %v1614_v54, %v2810_v38  ;;  %v1616_v34 = vpop.f32.mrb[15].mxu0  ;;  %v1687_v4 = vpop.f32.mrb[7].mxu1  ;;  %v2442_v18 = vadd.f32 %v1685_v1, %v2816_v49  ;;  %v1730_v49 = vld [vmem:[%s3173_s2 + $0x38] sm:$0xff] }
 0x906   :  { %v1617_v31 = vadd.f32 %v1616_v34, %v2812_v41  ;;  %v2443_v6 = vadd.f32 %v1687_v4, %v2814_v47  ;;  %v1729_v47 = vld [vmem:[%s3173_s2 + $0x30] sm:$0xff]  ;;  %s2657_s2 = smov [#allocation5]  }
 0x907   :  { %v1866_v32 = vmul.f32 -1.442695, %v1615_v30  ;;  %v2436_v44 = vpack.c.bf16 %v1730_v49, %v1729_v47  ;;  %s1828_s20 = sshll.u32 %s2657_s2, 4  ;;  %s1829_s20 = int_to_ptr.vmem [resolvable:$true] %s1828_s20 }
 0x908   :  { %v1867_v8 = vmul.f32 -1.442695, %v1617_v31  ;;  %v1868_v12 = vmul.f32 -1.442695, %v2443_v6  ;;  %s2624_s21 = scalar_lea.vmem %s1829_s20, 16  ;;  %s2628_s22 = scalar_lea.vmem %s1829_s20, 32 }
 0x909   :  { %2582 = vpow2.f32 %v1866_v32  ;;  %2437 = vmatpush3.bf16.msra.mxu0 %v2436_v44  ;;  %p2625_p8 = scmp.ne.s32.totalorder %s1829_s20, %s2624_s21  ;;  %p2629_p9 = scmp.lt.s32.totalorder %s1829_s20, %s1829_s20 }
 0x90a   :  { %2584 = vpow2.f32 %v1867_v8  ;;  %p2630_p10 = scmp.lt.s32.totalorder %s2628_s22, %s2624_s21 }
 0x90b   :  { %2586 = vpow2.f32 %v1868_v12 }
 0x90c   :  { %2588 = vtanh.f32 %v2442_v18  ;;  %p2631_p11 = por %p2630_p10, %p2629_p9 }
 0x90e   :  { %p2632_p12 = pnand %p2631_p11, %p2625_p8 }
 0x913   :  { %v2583_v19 = vpop.eup %2582 }
 0x914   :  { %v2585_v59 = vpop.eup %2584  ;;  %v1693_v58 = vadd.f32 1.0, %v2583_v19 }
 0x915   :  { %v1699_v22 = vadd.f32 1.0, %v2585_v59  ;;  %v2587_v38 = vpop.eup %2586 }
 0x916   :  { %2590 = vrcp.f32 %v1693_v58  ;;  %v2589_v21 = vpop.eup %2588  ;;  %v1706_v35 = vadd.f32 1.0, %v2587_v38 }
 0x917   :  { %2592 = vrcp.f32 %v1699_v22 }
 0x918   :  { %2594 = vrcp.f32 %v1706_v35 }
 0x920   :  { %v2591_v41 = vpop.eup %2590 }
 0x921   :  { %v2593_v24 = vpop.eup %2592  ;;  %v1710_v29 = vmul.f32 %v2591_v41, %v2589_v21 }
 0x922   :  { %v1709_v39 = vmul.f32 %v2593_v24, %v1545_v63  ;;  %v2595_v48 = vpop.eup %2594 }
 0x924   :  { %v1711_v43 = vadd.f32 %v1710_v29, %v1709_v39 }
 0x926   :  { %2596 = vtanh.f32 %v1711_v43 }
 0x930   :  { %v2597_v52 = vpop.eup %2596 }
 0x931   :  { %v1713_v53 = vmul.f32 %v2597_v52, %v2595_v48 }
 0x933   :  { %1715 = vrot.lane.b32.xlu0 %v1713_v53, %s2656_s17 }
 0x937   :  { %1719 = vrot.lane.b32.xlu0 %v3081_v36, %s2656_s17 }
 0x9a5   :  { %v1716_v57 = vpop.permute.xlu0 %1715 }
 0x9a9   :  { %v1720_v61 = vpop.permute.xlu0 %1719 }
 0x9aa   :  { %v1722_v2 = vsel %vm134_vm0, %v1716_v57, %v1720_v61 }
 0x9ab   :  { %1896 = vmatmul.mubr.msk.f32.vlgmr.msra.gmra.mrb[16].mxu0 %vm1732_vm3, %v1722_v2 }
 0xa7e   :  { %v1802_v7 = vpop.f32.mrb[16].mxu0 }
 0xa7f   :  { %v1803_v14 = vadd.f32 %v1802_v7, %v1731_v3  ;;  %v1897_v0 = vpop.f32.mrb[17].mxu0 }
 0xa81   :  { %v1806_v15 = vmax.f32 %v1803_v14, 0.0 }
 0xa83   :  { %v1808_v16 = vsel %vm1807_vm4, %v1806_v15, -inf }
 0xa84   :  { %1809 = vmax.xlane.f32.xlu1 %v1808_v16 }
 0xb11   :  { %v1810_v20 = vpop.xlane.xlu1 %1809 }
 0xb12   :  { %v1811_v36 = vsub.f32 %v1806_v15, %v1810_v20 }
 0xb14   :  { %v1812_v26 = vmul.f32 1.442695, %v1811_v36 }
 0xb16   :  { %2598 = vpow2.f32 %v1812_v26 }
 0xb20   :  { %v2599_v27 = vpop.eup %2598 }
 0xb21   :  { %v1814_v28 = vsel %vm1807_vm4, %v2599_v27, 0.0 }
 0xb22   :  { %1815 = vadd.xlane.f32.xlu1 %v1814_v28 }
 0xbaf   :  { %v1816_v33 = vpop.xlane.xlu1 %1815 }
 0xbb0   :  { %2600 = vlog2.f32 %v1816_v33 }
 0xbba   :  { %v2601_v42 = vpop.eup %2600 }
 0xbbb   :  { %v1818_v45 = vmul.f32 0.6931472, %v2601_v42 }
 0xbbd   :  { %v1819_v46 = vadd.f32 %v1818_v45, %v1810_v20 }
 0xbbf   :  { %v1820_v51 = vsub.f32 %v1806_v15, %v1819_v46 }
 0xbc1   :  { %1821 = vst.msk [vmem:[#allocation5] sm:$0x1] %vm1807_vm4, %v1820_v51 }
 0xbc2   :  { %2635 = shalt.err (!%p2632_p12)
}
 0xbc3   :  { %s2636_s25 = scalar_lea.hbm %s3174_s3, 16 }
 0xbc4   :  { %p2637_p13 = scmp.ne.s32.totalorder %s3174_s3, %s2636_s25  ;;  %p2640_p0 = scmp.lt.u32.totalorder %s2636_s25, %s3174_s3 }
 0xbc6   :  { %p2642_p1 = pnand %p2640_p0, %p2637_p13 }
 0xbc8   :  { %2645 = shalt.err (!%p2642_p1)
}
 0xbc9   :  { %1831 = dma.vmem_to_hbm [thread:$0]  %s1829_s20, 16, %s3174_s3, [#allocation4]  }
 0xbca   :  { %2648 = dma.done.wait [#allocation4], 16  }
 0xbcb   :  { %2649 = vsyncadd [#allocation4], 4294967280 }
 0xbcc   :  { %1835 = vsyncpa [#allocation3], 1 }
 0xbcd   :  { %1836 = vsyncpa [#allocation4], 1 }

</bundles_post_ra>
